<compile_context>
chip_gen: v7x
topology: tpu7x:2x2x1
jax: 0.10.0
libtpu: 0.0.40
codegen_flags: <defaults>
</compile_context>

<pallas_src>
import functools

import jax
import jax.numpy as jnp
from jax.experimental import pallas as pl
from jax.experimental.pallas import tpu as pltpu


def _round_up(x, m):
    return ((x + m - 1) // m) * m


# ---------------------------------------------------------------------------
# Fused Refinement kernel.  One grid step == one batch element.
#   x_ref:    (dim, T)        input in NCT layout (per batch)
#   w_in:     (C, dim)        input 1x1 conv weight     (compute_dtype)
#   b_in:     (C, 1)          input bias                (fp32)
#   w3:       (3L, C, C)      dilated taps, layer-major: [l0 t-d, l0 t, l0 t+d, l1 ...]
#   b1:       (L, C, 1)       dilated conv bias
#   wp:       (L, C, C)       per-layer 1x1 conv weight
#   b2:       (L, C, 1)       per-layer 1x1 bias
#   w_out:    (K, C)          output 1x1 conv weight
#   b_out:    (K, 1)          output bias
#   o_ref:    (K, T)          output (per batch), lane-dense over time
#   h_ref:    (C, Tpad) fp32  VMEM-resident activation, Tpad = T + 2*D
# ---------------------------------------------------------------------------
def _refinement_kernel(L, D, T, cdt,
                       x_ref, w_in_ref, b_in_ref,
                       w3_ref, b1_ref, wp_ref, b2_ref,
                       w_out_ref, b_out_ref,
                       o_ref, h_ref):
    # Input 1x1 conv straight from NCT layout: (C, dim) @ (dim, T) -> (C, T).
    h0 = jnp.dot(w_in_ref[...], x_ref[...].astype(cdt),
                 preferred_element_type=jnp.float32) + b_in_ref[...]

    # Zero the scratch ONCE per batch (halos must read as zeros for the taps),
    # then place the real activation at lane offset D.  Halos stay zero for
    # the whole layer stack — no per-layer halo writeback.
    h_ref[...] = jnp.zeros_like(h_ref)
    h_ref[:, D:D + T] = h0

    # Static layer loop: dilation d = 2^i is a compile-time constant, so the
    # shifted taps are static lane slices of the VMEM-resident activation.
    for i in range(L):
        d = 1 << i
        xl = h_ref[:, D - d:D - d + T]                 # x[t - d]
        xc = h_ref[:, D:D + T]                         # x[t]        (fp32)
        xr = h_ref[:, D + d:D + d + T]                 # x[t + d]

        # Dilated k=3 conv as three accumulating MXU matmuls (no lane concat).
        acc = jnp.dot(w3_ref[3 * i + 0], xl.astype(cdt),
                      preferred_element_type=jnp.float32)
        acc = acc + jnp.dot(w3_ref[3 * i + 1], xc.astype(cdt),
                            preferred_element_type=jnp.float32)
        acc = acc + jnp.dot(w3_ref[3 * i + 2], xr.astype(cdt),
                            preferred_element_type=jnp.float32)
        hidden = jnp.maximum(acc + b1_ref[i], 0.0)     # ReLU, fp32

        y = jnp.dot(wp_ref[i], hidden.astype(cdt),
                    preferred_element_type=jnp.float32) + b2_ref[i]
        # TODO(synk): dropout identity (eval mode).

        h_ref[:, D:D + T] = xc + y                     # residual, fp32 state

    # Output 1x1 conv directly in (K, T) layout: (K, C) @ (C, T) -> (K, T).
    out = jnp.dot(w_out_ref[...], h_ref[:, D:D + T].astype(cdt),
                  preferred_element_type=jnp.float32) + b_out_ref[...]
    o_ref[...] = out.astype(o_ref.dtype)


# ---------------------------------------------------------------------------
# Parameter preparation: stack/cast all weights ONCE into the kernel layout.
# ---------------------------------------------------------------------------
def prepare_refinement_params(params, *, compute_dtype=jnp.float32):
    (w_in, b_in), layer_params, (w_out, b_out) = params
    C = w_in.shape[0]
    K = w_out.shape[0]
    L = len(layer_params)
    cdt = compute_dtype

    w_in2 = w_in[:, :, 0].astype(cdt)                               # (C, dim)
    b_in2 = b_in.reshape(C, 1).astype(jnp.float32)

    if L > 0:
        w3_all = jnp.stack(
            [w_dil[:, :, k] for (w_dil, _, _, _) in layer_params
             for k in range(3)], axis=0).astype(cdt)                # (3L, C, C)
        b1_all = jnp.stack(
            [b_dil.reshape(C, 1) for (_, b_dil, _, _) in layer_params],
            axis=0).astype(jnp.float32)                             # (L, C, 1)
        wp_all = jnp.stack(
            [w_1x1[:, :, 0] for (_, _, w_1x1, _) in layer_params],
            axis=0).astype(cdt)                                     # (L, C, C)
        b2_all = jnp.stack(
            [b_1x1.reshape(C, 1) for (_, _, _, b_1x1) in layer_params],
            axis=0).astype(jnp.float32)                             # (L, C, 1)
    else:  # dummy slabs so BlockSpecs stay well-formed; loop is skipped.
        w3_all = jnp.zeros((3, C, C), cdt)
        b1_all = jnp.zeros((1, C, 1), jnp.float32)
        wp_all = jnp.zeros((1, C, C), cdt)
        b2_all = jnp.zeros((1, C, 1), jnp.float32)

    w_out2 = w_out[:, :, 0].astype(cdt)                             # (K, C)
    b_out2 = b_out.reshape(K, 1).astype(jnp.float32)

    return (w_in2, b_in2, w3_all, b1_all, wp_all, b2_all, w_out2, b_out2)


# ---------------------------------------------------------------------------
# Full Refinement forward: one fused pallas_call over the batch.
# ---------------------------------------------------------------------------
def refinement_forward(x_nct, params, *, compute_dtype=jnp.float32):
    """x_nct: (N, dim, T). params: ((w_in,b_in), layer_params, (w_out,b_out))."""
    (w_in, _), layer_params, (w_out, _) = params
    N, dim, T = x_nct.shape
    C = w_in.shape[0]
    K = w_out.shape[0]
    L = len(layer_params)
    cdt = compute_dtype

    w_in2, b_in2, w3_all, b1_all, wp_all, b2_all, w_out2, b_out2 = \
        prepare_refinement_params(params, compute_dtype=cdt)
    L3 = w3_all.shape[0]
    L_eff = wp_all.shape[0]

    # Halo width = max dilation rounded up to a full 128-lane tile so the
    # residual store [:, D:D+T] starts lane-aligned.
    D = _round_up(max(1, 2 ** (L - 1)), 128) if L > 0 else 0
    Tpad = T + 2 * D

    kernel = functools.partial(_refinement_kernel, L, D, T, cdt)

    # Rough VMEM budget (double-buffered per-batch blocks + weights + scratch);
    # clamp to 64 MiB so it is valid on v7x as well as v5e/v6e.
    act_bytes = 2 * (dim * T * x_nct.dtype.itemsize + K * T * 4)
    w_bytes = sum(int(a.size) * a.dtype.itemsize
                  for a in (w_in2, b_in2, w3_all, b1_all, wp_all, b2_all,
                            w_out2, b_out2))
    scratch_bytes = C * Tpad * 4
    vmem_limit = int(min(64 * 1024 * 1024,
                         max(32 * 1024 * 1024,
                             2 * (act_bytes + 2 * w_bytes + scratch_bytes))))

    return pl.pallas_call(
        kernel,
        out_shape=jax.ShapeDtypeStruct((N, K, T), jnp.float32),
        grid=(N,),
        in_specs=[
            pl.BlockSpec((pl.Squeezed(), dim, T), lambda n: (n, 0, 0)),  # x (NCT)
            pl.BlockSpec((C, dim), lambda n: (0, 0)),                    # w_in
            pl.BlockSpec((C, 1), lambda n: (0, 0)),                      # b_in
            pl.BlockSpec((L3, C, C), lambda n: (0, 0, 0)),               # dilated taps
            pl.BlockSpec((L_eff, C, 1), lambda n: (0, 0, 0)),            # b1
            pl.BlockSpec((L_eff, C, C), lambda n: (0, 0, 0)),            # wp (1x1)
            pl.BlockSpec((L_eff, C, 1), lambda n: (0, 0, 0)),            # b2
            pl.BlockSpec((K, C), lambda n: (0, 0)),                      # w_out
            pl.BlockSpec((K, 1), lambda n: (0, 0)),                      # b_out
        ],
        out_specs=pl.BlockSpec((pl.Squeezed(), K, T), lambda n: (n, 0, 0)),
        scratch_shapes=[pltpu.VMEM((C, Tpad), jnp.float32)],
        compiler_params=pltpu.CompilerParams(
            dimension_semantics=("parallel",),
            vmem_limit_bytes=vmem_limit),
    )(x_nct, w_in2, b_in2, w3_all, b1_all, wp_all, b2_all, w_out2, b_out2)


# ---------------------------------------------------------------------------
# Pure-JAX reference (matches PyTorch forward, dropout in eval mode).
# ---------------------------------------------------------------------------
def ref_refinement(x_nct, params):
    (w_in, b_in), layer_params, (w_out, b_out) = params
    h = jnp.einsum("oc,nct->not", w_in[:, :, 0], x_nct) + b_in[None, :, None]
    for i, (w_dil, b_dil, w_1x1, b_1x1) in enumerate(layer_params):
        d = 2 ** i
        N, C, T = h.shape
        h_pad = jnp.pad(h, ((0, 0), (0, 0), (d, d)))
        out = (jnp.einsum("oc,nct->not", w_dil[:, :, 0], h_pad[:, :, 0:T])
               + jnp.einsum("oc,nct->not", w_dil[:, :, 1], h_pad[:, :, d:d + T])
               + jnp.einsum("oc,nct->not", w_dil[:, :, 2], h_pad[:, :, 2 * d:2 * d + T])
               + b_dil[None, :, None])
        out = jnp.maximum(out, 0.0)
        out = jnp.einsum("oc,nct->not", w_1x1[:, :, 0], out) + b_1x1[None, :, None]
        h = h + out
    return jnp.einsum("oc,nct->not", w_out[:, :, 0], h) + b_out[None, :, None]


if __name__ == "__main__":
    # Small deterministic setup.
    N, dim, T = 2, 48, 96
    num_layers, num_f_maps, num_classes = 3, 32, 16

    key = jax.random.PRNGKey(0)
    n_keys = 1 + 2 + 4 * num_layers + 2
    keys = list(jax.random.split(key, n_keys))

    x = jax.random.normal(keys.pop(), (N, dim, T), dtype=jnp.float32)

    w_in = jax.random.normal(keys.pop(), (num_f_maps, dim, 1), jnp.float32) * 0.1
    b_in = jax.random.normal(keys.pop(), (num_f_maps,), jnp.float32) * 0.1

    layer_params = []
    for _ in range(num_layers):
        w_dil = jax.random.normal(keys.pop(), (num_f_maps, num_f_maps, 3), jnp.float32) * 0.1
        b_dil = jax.random.normal(keys.pop(), (num_f_maps,), jnp.float32) * 0.1
        w_1x1 = jax.random.normal(keys.pop(), (num_f_maps, num_f_maps, 1), jnp.float32) * 0.1
        b_1x1 = jax.random.normal(keys.pop(), (num_f_maps,), jnp.float32) * 0.1
        layer_params.append((w_dil, b_dil, w_1x1, b_1x1))
    layer_params = tuple(layer_params)

    w_out = jax.random.normal(keys.pop(), (num_classes, num_f_maps, 1), jnp.float32) * 0.1
    b_out = jax.random.normal(keys.pop(), (num_classes,), jnp.float32) * 0.1

    params = ((w_in, b_in), layer_params, (w_out, b_out))

    ref = ref_refinement(x, params)

    # fp32 path: tight check against the reference.
    fwd_f32 = jax.jit(functools.partial(refinement_forward,
                                        compute_dtype=jnp.float32))
    out = jax.block_until_ready(fwd_f32(x, params))
    assert out.shape == (N, num_classes, T), out.shape
    assert jnp.allclose(out, ref, atol=1e-4, rtol=1e-4), (
        float(jnp.max(jnp.abs(out - ref))))

    # bf16-operand path (v6e/v7x MXU); fp32 accumulation, loose tolerance.
    fwd_bf16 = jax.jit(functools.partial(refinement_forward,
                                         compute_dtype=jnp.bfloat16))
    out_bf = jax.block_until_ready(fwd_bf16(x, params))
    assert jnp.allclose(out_bf, ref, atol=5e-2, rtol=5e-2), (
        float(jnp.max(jnp.abs(out_bf - ref))))

    print("KERNEL_OK")
</pallas_src>

<mosaic_0001>
module attributes {stable_mosaic.version = 11 : i64} {
  func.func @_refinement_kernel(%arg0: i32, %arg1: memref<1x48x96xf32, #tpu.memory_space<vmem>>, %arg2: memref<32x48xf32, #tpu.memory_space<vmem>>, %arg3: memref<32x1xf32, #tpu.memory_space<vmem>>, %arg4: memref<9x32x32xf32, #tpu.memory_space<vmem>>, %arg5: memref<3x32x1xf32, #tpu.memory_space<vmem>>, %arg6: memref<3x32x32xf32, #tpu.memory_space<vmem>>, %arg7: memref<3x32x1xf32, #tpu.memory_space<vmem>>, %arg8: memref<16x32xf32, #tpu.memory_space<vmem>>, %arg9: memref<16x1xf32, #tpu.memory_space<vmem>>, %arg10: memref<1x16x96xf32, #tpu.memory_space<vmem>>, %arg11: memref<32x352xf32, #tpu.memory_space<vmem>>) attributes {dimension_semantics = [#tpu.dimension_semantics<parallel>], iteration_bounds = array<i64: 2>, scalar_prefetch = 0 : i64, scratch_operands = 1 : i64, tpu.core_type = #tpu.core_type<tc>, window_params = [{transform_indices = @transform_0, window_bounds = array<i64: 1, 48, 96>}, {pipeline_mode = #tpu.pipeline_mode<synchronous>, transform_indices = @transform_1, window_bounds = array<i64: 32, 48>}, {pipeline_mode = #tpu.pipeline_mode<synchronous>, transform_indices = @transform_2, window_bounds = array<i64: 32, 1>}, {pipeline_mode = #tpu.pipeline_mode<synchronous>, transform_indices = @transform_3, window_bounds = array<i64: 9, 32, 32>}, {pipeline_mode = #tpu.pipeline_mode<synchronous>, transform_indices = @transform_4, window_bounds = array<i64: 3, 32, 1>}, {pipeline_mode = #tpu.pipeline_mode<synchronous>, transform_indices = @transform_5, window_bounds = array<i64: 3, 32, 32>}, {pipeline_mode = #tpu.pipeline_mode<synchronous>, transform_indices = @transform_6, window_bounds = array<i64: 3, 32, 1>}, {pipeline_mode = #tpu.pipeline_mode<synchronous>, transform_indices = @transform_7, window_bounds = array<i64: 16, 32>}, {pipeline_mode = #tpu.pipeline_mode<synchronous>, transform_indices = @transform_8, window_bounds = array<i64: 16, 1>}, {transform_indices = @transform_9, window_bounds = array<i64: 1, 16, 96>}]} {
    %c0 = arith.constant 0 : index
    %c0_0 = arith.constant 0 : index
    %0 = vector.load %arg2[%c0, %c0_0] : memref<32x48xf32, #tpu.memory_space<vmem>>, vector<32x48xf32>
    %c0_1 = arith.constant 0 : index
    %c0_2 = arith.constant 0 : index
    %c0_3 = arith.constant 0 : index
    %1 = vector.load %arg1[%c0_1, %c0_2, %c0_3] : memref<1x48x96xf32, #tpu.memory_space<vmem>>, vector<1x48x96xf32>
    %2 = vector.shape_cast %1 : vector<1x48x96xf32> to vector<48x96xf32>
    %cst = arith.constant dense<0.000000e+00> : vector<32x96xf32>
    %3 = tpu.matmul %0, %2, %cst {dimension_numbers = #tpu.dot_dimension_numbers<[1], [0], [0], [1], [0, 0, 1, 1], [], []>} : vector<32x48xf32>, vector<48x96xf32>, vector<32x96xf32> -> vector<32x96xf32>
    %c0_4 = arith.constant 0 : index
    %c0_5 = arith.constant 0 : index
    %4 = vector.load %arg3[%c0_4, %c0_5] : memref<32x1xf32, #tpu.memory_space<vmem>>, vector<32x1xf32>
    %5 = vector.broadcast %4 : vector<32x1xf32> to vector<32x96xf32>
    %6 = arith.addf %3, %5 : vector<32x96xf32>
    %cst_6 = arith.constant 0.000000e+00 : f32
    %7 = vector.broadcast %cst_6 : f32 to vector<32x352xf32>
    %c0_7 = arith.constant 0 : index
    %c0_8 = arith.constant 0 : index
    %8 = vector.load %arg11[%c0_7, %c0_8] : memref<32x352xf32, #tpu.memory_space<vmem>>, vector<32x352xf32>
    tpu.vector_store %arg11[%c0_7, %c0_8], %7 {strides = array<i32>} : memref<32x352xf32, #tpu.memory_space<vmem>>, vector<32x352xf32>,
    %c0_9 = arith.constant 0 : index
    %c128 = arith.constant 128 : index
    %9 = vector.load %arg11[%c0_9, %c128] : memref<32x352xf32, #tpu.memory_space<vmem>>, vector<32x96xf32>
    tpu.vector_store %arg11[%c0_9, %c128], %6 {strides = array<i32>} : memref<32x352xf32, #tpu.memory_space<vmem>>, vector<32x96xf32>,
    %c0_10 = arith.constant 0 : index
    %c127 = arith.constant 127 : index
    %10 = vector.load %arg11[%c0_10, %c127] : memref<32x352xf32, #tpu.memory_space<vmem>>, vector<32x96xf32>
    %c0_11 = arith.constant 0 : index
    %c128_12 = arith.constant 128 : index
    %11 = vector.load %arg11[%c0_11, %c128_12] : memref<32x352xf32, #tpu.memory_space<vmem>>, vector<32x96xf32>
    %c0_13 = arith.constant 0 : index
    %c129 = arith.constant 129 : index
    %12 = vector.load %arg11[%c0_13, %c129] : memref<32x352xf32, #tpu.memory_space<vmem>>, vector<32x96xf32>
    %c0_14 = arith.constant 0 : index
    %c0_15 = arith.constant 0 : index
    %c0_16 = arith.constant 0 : index
    %13 = vector.load %arg4[%c0_14, %c0_15, %c0_16] : memref<9x32x32xf32, #tpu.memory_space<vmem>>, vector<1x32x32xf32>
    %14 = vector.shape_cast %13 : vector<1x32x32xf32> to vector<32x32xf32>
    %cst_17 = arith.constant dense<0.000000e+00> : vector<32x96xf32>
    %15 = tpu.matmul %14, %10, %cst_17 {dimension_numbers = #tpu.dot_dimension_numbers<[1], [0], [0], [1], [0, 0, 1, 1], [], []>} : vector<32x32xf32>, vector<32x96xf32>, vector<32x96xf32> -> vector<32x96xf32>
    %c1 = arith.constant 1 : index
    %c0_18 = arith.constant 0 : index
    %c0_19 = arith.constant 0 : index
    %16 = vector.load %arg4[%c1, %c0_18, %c0_19] : memref<9x32x32xf32, #tpu.memory_space<vmem>>, vector<1x32x32xf32>
    %17 = vector.shape_cast %16 : vector<1x32x32xf32> to vector<32x32xf32>
    %cst_20 = arith.constant dense<0.000000e+00> : vector<32x96xf32>
    %18 = tpu.matmul %17, %11, %cst_20 {dimension_numbers = #tpu.dot_dimension_numbers<[1], [0], [0], [1], [0, 0, 1, 1], [], []>} : vector<32x32xf32>, vector<32x96xf32>, vector<32x96xf32> -> vector<32x96xf32>
    %19 = arith.addf %15, %18 : vector<32x96xf32>
    %c2 = arith.constant 2 : index
    %c0_21 = arith.constant 0 : index
    %c0_22 = arith.constant 0 : index
    %20 = vector.load %arg4[%c2, %c0_21, %c0_22] : memref<9x32x32xf32, #tpu.memory_space<vmem>>, vector<1x32x32xf32>
    %21 = vector.shape_cast %20 : vector<1x32x32xf32> to vector<32x32xf32>
    %cst_23 = arith.constant dense<0.000000e+00> : vector<32x96xf32>
    %22 = tpu.matmul %21, %12, %cst_23 {dimension_numbers = #tpu.dot_dimension_numbers<[1], [0], [0], [1], [0, 0, 1, 1], [], []>} : vector<32x32xf32>, vector<32x96xf32>, vector<32x96xf32> -> vector<32x96xf32>
    %23 = arith.addf %19, %22 : vector<32x96xf32>
    %c0_24 = arith.constant 0 : index
    %c0_25 = arith.constant 0 : index
    %c0_26 = arith.constant 0 : index
    %24 = vector.load %arg5[%c0_24, %c0_25, %c0_26] : memref<3x32x1xf32, #tpu.memory_space<vmem>>, vector<1x32x1xf32>
    %25 = vector.shape_cast %24 : vector<1x32x1xf32> to vector<32x1xf32>
    %26 = vector.broadcast %25 : vector<32x1xf32> to vector<32x96xf32>
    %27 = arith.addf %23, %26 : vector<32x96xf32>
    %cst_27 = arith.constant 0.000000e+00 : f32
    %28 = vector.broadcast %cst_27 : f32 to vector<32x96xf32>
    %29 = arith.maximumf %27, %28 : vector<32x96xf32>
    %c0_28 = arith.constant 0 : index
    %c0_29 = arith.constant 0 : index
    %c0_30 = arith.constant 0 : index
    %30 = vector.load %arg6[%c0_28, %c0_29, %c0_30] : memref<3x32x32xf32, #tpu.memory_space<vmem>>, vector<1x32x32xf32>
    %31 = vector.shape_cast %30 : vector<1x32x32xf32> to vector<32x32xf32>
    %cst_31 = arith.constant dense<0.000000e+00> : vector<32x96xf32>
    %32 = tpu.matmul %31, %29, %cst_31 {dimension_numbers = #tpu.dot_dimension_numbers<[1], [0], [0], [1], [0, 0, 1, 1], [], []>} : vector<32x32xf32>, vector<32x96xf32>, vector<32x96xf32> -> vector<32x96xf32>
    %c0_32 = arith.constant 0 : index
    %c0_33 = arith.constant 0 : index
    %c0_34 = arith.constant 0 : index
    %33 = vector.load %arg7[%c0_32, %c0_33, %c0_34] : memref<3x32x1xf32, #tpu.memory_space<vmem>>, vector<1x32x1xf32>
    %34 = vector.shape_cast %33 : vector<1x32x1xf32> to vector<32x1xf32>
    %35 = vector.broadcast %34 : vector<32x1xf32> to vector<32x96xf32>
    %36 = arith.addf %32, %35 : vector<32x96xf32>
    %37 = arith.addf %11, %36 : vector<32x96xf32>
    %c0_35 = arith.constant 0 : index
    %c128_36 = arith.constant 128 : index
    %38 = vector.load %arg11[%c0_35, %c128_36] : memref<32x352xf32, #tpu.memory_space<vmem>>, vector<32x96xf32>
    tpu.vector_store %arg11[%c0_35, %c128_36], %37 {strides = array<i32>} : memref<32x352xf32, #tpu.memory_space<vmem>>, vector<32x96xf32>,
    %c0_37 = arith.constant 0 : index
    %c126 = arith.constant 126 : index
    %39 = vector.load %arg11[%c0_37, %c126] : memref<32x352xf32, #tpu.memory_space<vmem>>, vector<32x96xf32>
    %c0_38 = arith.constant 0 : index
    %c128_39 = arith.constant 128 : index
    %40 = vector.load %arg11[%c0_38, %c128_39] : memref<32x352xf32, #tpu.memory_space<vmem>>, vector<32x96xf32>
    %c0_40 = arith.constant 0 : index
    %c130 = arith.constant 130 : index
    %41 = vector.load %arg11[%c0_40, %c130] : memref<32x352xf32, #tpu.memory_space<vmem>>, vector<32x96xf32>
    %c3 = arith.constant 3 : index
    %c0_41 = arith.constant 0 : index
    %c0_42 = arith.constant 0 : index
    %42 = vector.load %arg4[%c3, %c0_41, %c0_42] : memref<9x32x32xf32, #tpu.memory_space<vmem>>, vector<1x32x32xf32>
    %43 = vector.shape_cast %42 : vector<1x32x32xf32> to vector<32x32xf32>
    %cst_43 = arith.constant dense<0.000000e+00> : vector<32x96xf32>
    %44 = tpu.matmul %43, %39, %cst_43 {dimension_numbers = #tpu.dot_dimension_numbers<[1], [0], [0], [1], [0, 0, 1, 1], [], []>} : vector<32x32xf32>, vector<32x96xf32>, vector<32x96xf32> -> vector<32x96xf32>
    %c4 = arith.constant 4 : index
    %c0_44 = arith.constant 0 : index
    %c0_45 = arith.constant 0 : index
    %45 = vector.load %arg4[%c4, %c0_44, %c0_45] : memref<9x32x32xf32, #tpu.memory_space<vmem>>, vector<1x32x32xf32>
    %46 = vector.shape_cast %45 : vector<1x32x32xf32> to vector<32x32xf32>
    %cst_46 = arith.constant dense<0.000000e+00> : vector<32x96xf32>
    %47 = tpu.matmul %46, %40, %cst_46 {dimension_numbers = #tpu.dot_dimension_numbers<[1], [0], [0], [1], [0, 0, 1, 1], [], []>} : vector<32x32xf32>, vector<32x96xf32>, vector<32x96xf32> -> vector<32x96xf32>
    %48 = arith.addf %44, %47 : vector<32x96xf32>
    %c5 = arith.constant 5 : index
    %c0_47 = arith.constant 0 : index
    %c0_48 = arith.constant 0 : index
    %49 = vector.load %arg4[%c5, %c0_47, %c0_48] : memref<9x32x32xf32, #tpu.memory_space<vmem>>, vector<1x32x32xf32>
    %50 = vector.shape_cast %49 : vector<1x32x32xf32> to vector<32x32xf32>
    %cst_49 = arith.constant dense<0.000000e+00> : vector<32x96xf32>
    %51 = tpu.matmul %50, %41, %cst_49 {dimension_numbers = #tpu.dot_dimension_numbers<[1], [0], [0], [1], [0, 0, 1, 1], [], []>} : vector<32x32xf32>, vector<32x96xf32>, vector<32x96xf32> -> vector<32x96xf32>
    %52 = arith.addf %48, %51 : vector<32x96xf32>
    %c1_50 = arith.constant 1 : index
    %c0_51 = arith.constant 0 : index
    %c0_52 = arith.constant 0 : index
    %53 = vector.load %arg5[%c1_50, %c0_51, %c0_52] : memref<3x32x1xf32, #tpu.memory_space<vmem>>, vector<1x32x1xf32>
    %54 = vector.shape_cast %53 : vector<1x32x1xf32> to vector<32x1xf32>
    %55 = vector.broadcast %54 : vector<32x1xf32> to vector<32x96xf32>
    %56 = arith.addf %52, %55 : vector<32x96xf32>
    %cst_53 = arith.constant 0.000000e+00 : f32
    %57 = vector.broadcast %cst_53 : f32 to vector<32x96xf32>
    %58 = arith.maximumf %56, %57 : vector<32x96xf32>
    %c1_54 = arith.constant 1 : index
    %c0_55 = arith.constant 0 : index
    %c0_56 = arith.constant 0 : index
    %59 = vector.load %arg6[%c1_54, %c0_55, %c0_56] : memref<3x32x32xf32, #tpu.memory_space<vmem>>, vector<1x32x32xf32>
    %60 = vector.shape_cast %59 : vector<1x32x32xf32> to vector<32x32xf32>
    %cst_57 = arith.constant dense<0.000000e+00> : vector<32x96xf32>
    %61 = tpu.matmul %60, %58, %cst_57 {dimension_numbers = #tpu.dot_dimension_numbers<[1], [0], [0], [1], [0, 0, 1, 1], [], []>} : vector<32x32xf32>, vector<32x96xf32>, vector<32x96xf32> -> vector<32x96xf32>
    %c1_58 = arith.constant 1 : index
    %c0_59 = arith.constant 0 : index
    %c0_60 = arith.constant 0 : index
    %62 = vector.load %arg7[%c1_58, %c0_59, %c0_60] : memref<3x32x1xf32, #tpu.memory_space<vmem>>, vector<1x32x1xf32>
    %63 = vector.shape_cast %62 : vector<1x32x1xf32> to vector<32x1xf32>
    %64 = vector.broadcast %63 : vector<32x1xf32> to vector<32x96xf32>
    %65 = arith.addf %61, %64 : vector<32x96xf32>
    %66 = arith.addf %40, %65 : vector<32x96xf32>
    %c0_61 = arith.constant 0 : index
    %c128_62 = arith.constant 128 : index
    %67 = vector.load %arg11[%c0_61, %c128_62] : memref<32x352xf32, #tpu.memory_space<vmem>>, vector<32x96xf32>
    tpu.vector_store %arg11[%c0_61, %c128_62], %66 {strides = array<i32>} : memref<32x352xf32, #tpu.memory_space<vmem>>, vector<32x96xf32>,
    %c0_63 = arith.constant 0 : index
    %c124 = arith.constant 124 : index
    %68 = vector.load %arg11[%c0_63, %c124] : memref<32x352xf32, #tpu.memory_space<vmem>>, vector<32x96xf32>
    %c0_64 = arith.constant 0 : index
    %c128_65 = arith.constant 128 : index
    %69 = vector.load %arg11[%c0_64, %c128_65] : memref<32x352xf32, #tpu.memory_space<vmem>>, vector<32x96xf32>
    %c0_66 = arith.constant 0 : index
    %c132 = arith.constant 132 : index
    %70 = vector.load %arg11[%c0_66, %c132] : memref<32x352xf32, #tpu.memory_space<vmem>>, vector<32x96xf32>
    %c6 = arith.constant 6 : index
    %c0_67 = arith.constant 0 : index
    %c0_68 = arith.constant 0 : index
    %71 = vector.load %arg4[%c6, %c0_67, %c0_68] : memref<9x32x32xf32, #tpu.memory_space<vmem>>, vector<1x32x32xf32>
    %72 = vector.shape_cast %71 : vector<1x32x32xf32> to vector<32x32xf32>
    %cst_69 = arith.constant dense<0.000000e+00> : vector<32x96xf32>
    %73 = tpu.matmul %72, %68, %cst_69 {dimension_numbers = #tpu.dot_dimension_numbers<[1], [0], [0], [1], [0, 0, 1, 1], [], []>} : vector<32x32xf32>, vector<32x96xf32>, vector<32x96xf32> -> vector<32x96xf32>
    %c7 = arith.constant 7 : index
    %c0_70 = arith.constant 0 : index
    %c0_71 = arith.constant 0 : index
    %74 = vector.load %arg4[%c7, %c0_70, %c0_71] : memref<9x32x32xf32, #tpu.memory_space<vmem>>, vector<1x32x32xf32>
    %75 = vector.shape_cast %74 : vector<1x32x32xf32> to vector<32x32xf32>
    %cst_72 = arith.constant dense<0.000000e+00> : vector<32x96xf32>
    %76 = tpu.matmul %75, %69, %cst_72 {dimension_numbers = #tpu.dot_dimension_numbers<[1], [0], [0], [1], [0, 0, 1, 1], [], []>} : vector<32x32xf32>, vector<32x96xf32>, vector<32x96xf32> -> vector<32x96xf32>
    %77 = arith.addf %73, %76 : vector<32x96xf32>
    %c8 = arith.constant 8 : index
    %c0_73 = arith.constant 0 : index
    %c0_74 = arith.constant 0 : index
    %78 = vector.load %arg4[%c8, %c0_73, %c0_74] : memref<9x32x32xf32, #tpu.memory_space<vmem>>, vector<1x32x32xf32>
    %79 = vector.shape_cast %78 : vector<1x32x32xf32> to vector<32x32xf32>
    %cst_75 = arith.constant dense<0.000000e+00> : vector<32x96xf32>
    %80 = tpu.matmul %79, %70, %cst_75 {dimension_numbers = #tpu.dot_dimension_numbers<[1], [0], [0], [1], [0, 0, 1, 1], [], []>} : vector<32x32xf32>, vector<32x96xf32>, vector<32x96xf32> -> vector<32x96xf32>
    %81 = arith.addf %77, %80 : vector<32x96xf32>
    %c2_76 = arith.constant 2 : index
    %c0_77 = arith.constant 0 : index
    %c0_78 = arith.constant 0 : index
    %82 = vector.load %arg5[%c2_76, %c0_77, %c0_78] : memref<3x32x1xf32, #tpu.memory_space<vmem>>, vector<1x32x1xf32>
    %83 = vector.shape_cast %82 : vector<1x32x1xf32> to vector<32x1xf32>
    %84 = vector.broadcast %83 : vector<32x1xf32> to vector<32x96xf32>
    %85 = arith.addf %81, %84 : vector<32x96xf32>
    %cst_79 = arith.constant 0.000000e+00 : f32
    %86 = vector.broadcast %cst_79 : f32 to vector<32x96xf32>
    %87 = arith.maximumf %85, %86 : vector<32x96xf32>
    %c2_80 = arith.constant 2 : index
    %c0_81 = arith.constant 0 : index
    %c0_82 = arith.constant 0 : index
    %88 = vector.load %arg6[%c2_80, %c0_81, %c0_82] : memref<3x32x32xf32, #tpu.memory_space<vmem>>, vector<1x32x32xf32>
    %89 = vector.shape_cast %88 : vector<1x32x32xf32> to vector<32x32xf32>
    %cst_83 = arith.constant dense<0.000000e+00> : vector<32x96xf32>
    %90 = tpu.matmul %89, %87, %cst_83 {dimension_numbers = #tpu.dot_dimension_numbers<[1], [0], [0], [1], [0, 0, 1, 1], [], []>} : vector<32x32xf32>, vector<32x96xf32>, vector<32x96xf32> -> vector<32x96xf32>
    %c2_84 = arith.constant 2 : index
    %c0_85 = arith.constant 0 : index
    %c0_86 = arith.constant 0 : index
    %91 = vector.load %arg7[%c2_84, %c0_85, %c0_86] : memref<3x32x1xf32, #tpu.memory_space<vmem>>, vector<1x32x1xf32>
    %92 = vector.shape_cast %91 : vector<1x32x1xf32> to vector<32x1xf32>
    %93 = vector.broadcast %92 : vector<32x1xf32> to vector<32x96xf32>
    %94 = arith.addf %90, %93 : vector<32x96xf32>
    %95 = arith.addf %69, %94 : vector<32x96xf32>
    %c0_87 = arith.constant 0 : index
    %c128_88 = arith.constant 128 : index
    %96 = vector.load %arg11[%c0_87, %c128_88] : memref<32x352xf32, #tpu.memory_space<vmem>>, vector<32x96xf32>
    tpu.vector_store %arg11[%c0_87, %c128_88], %95 {strides = array<i32>} : memref<32x352xf32, #tpu.memory_space<vmem>>, vector<32x96xf32>,
    %c0_89 = arith.constant 0 : index
    %c0_90 = arith.constant 0 : index
    %97 = vector.load %arg8[%c0_89, %c0_90] : memref<16x32xf32, #tpu.memory_space<vmem>>, vector<16x32xf32>
    %c0_91 = arith.constant 0 : index
    %c128_92 = arith.constant 128 : index
    %98 = vector.load %arg11[%c0_91, %c128_92] : memref<32x352xf32, #tpu.memory_space<vmem>>, vector<32x96xf32>
    %cst_93 = arith.constant dense<0.000000e+00> : vector<16x96xf32>
    %99 = tpu.matmul %97, %98, %cst_93 {dimension_numbers = #tpu.dot_dimension_numbers<[1], [0], [0], [1], [0, 0, 1, 1], [], []>} : vector<16x32xf32>, vector<32x96xf32>, vector<16x96xf32> -> vector<16x96xf32>
    %c0_94 = arith.constant 0 : index
    %c0_95 = arith.constant 0 : index
    %100 = vector.load %arg9[%c0_94, %c0_95] : memref<16x1xf32, #tpu.memory_space<vmem>>, vector<16x1xf32>
    %101 = vector.broadcast %100 : vector<16x1xf32> to vector<16x96xf32>
    %102 = arith.addf %99, %101 : vector<16x96xf32>
    %c0_96 = arith.constant 0 : index
    %c0_97 = arith.constant 0 : index
    %c0_98 = arith.constant 0 : index
    %103 = vector.load %arg10[%c0_96, %c0_97, %c0_98] : memref<1x16x96xf32, #tpu.memory_space<vmem>>, vector<1x16x96xf32>
    %104 = vector.shape_cast %103 : vector<1x16x96xf32> to vector<16x96xf32>
    %105 = vector.shape_cast %102 : vector<16x96xf32> to vector<1x16x96xf32>
    tpu.vector_store %arg10[%c0_96, %c0_97, %c0_98], %105 {strides = array<i32>} : memref<1x16x96xf32, #tpu.memory_space<vmem>>, vector<1x16x96xf32>,
    return
  }
  func.func @transform_0(%arg0: i32) -> (i32, i32, i32) {
    %c0_i32 = arith.constant 0 : i32
    %c0_i32_0 = arith.constant 0 : i32
    %c0_i32_1 = arith.constant 0 : i32
    return %arg0, %c0_i32, %c0_i32_0 : i32, i32, i32
  }
  func.func @transform_1(%arg0: i32) -> (i32, i32) {
    %c0_i32 = arith.constant 0 : i32
    %c0_i32_0 = arith.constant 0 : i32
    %c0_i32_1 = arith.constant 0 : i32
    return %c0_i32, %c0_i32_0 : i32, i32
  }
  func.func @transform_2(%arg0: i32) -> (i32, i32) {
    %c0_i32 = arith.constant 0 : i32
    %c0_i32_0 = arith.constant 0 : i32
    %c0_i32_1 = arith.constant 0 : i32
    return %c0_i32, %c0_i32_0 : i32, i32
  }
  func.func @transform_3(%arg0: i32) -> (i32, i32, i32) {
    %c0_i32 = arith.constant 0 : i32
    %c0_i32_0 = arith.constant 0 : i32
    %c0_i32_1 = arith.constant 0 : i32
    %c0_i32_2 = arith.constant 0 : i32
    return %c0_i32, %c0_i32_0, %c0_i32_1 : i32, i32, i32
  }
  func.func @transform_4(%arg0: i32) -> (i32, i32, i32) {
    %c0_i32 = arith.constant 0 : i32
    %c0_i32_0 = arith.constant 0 : i32
    %c0_i32_1 = arith.constant 0 : i32
    %c0_i32_2 = arith.constant 0 : i32
    return %c0_i32, %c0_i32_0, %c0_i32_1 : i32, i32, i32
  }
  func.func @transform_5(%arg0: i32) -> (i32, i32, i32) {
    %c0_i32 = arith.constant 0 : i32
    %c0_i32_0 = arith.constant 0 : i32
    %c0_i32_1 = arith.constant 0 : i32
    %c0_i32_2 = arith.constant 0 : i32
    return %c0_i32, %c0_i32_0, %c0_i32_1 : i32, i32, i32
  }
  func.func @transform_6(%arg0: i32) -> (i32, i32, i32) {
    %c0_i32 = arith.constant 0 : i32
    %c0_i32_0 = arith.constant 0 : i32
    %c0_i32_1 = arith.constant 0 : i32
    %c0_i32_2 = arith.constant 0 : i32
    return %c0_i32, %c0_i32_0, %c0_i32_1 : i32, i32, i32
  }
  func.func @transform_7(%arg0: i32) -> (i32, i32) {
    %c0_i32 = arith.constant 0 : i32
    %c0_i32_0 = arith.constant 0 : i32
    %c0_i32_1 = arith.constant 0 : i32
    return %c0_i32, %c0_i32_0 : i32, i32
  }
  func.func @transform_8(%arg0: i32) -> (i32, i32) {
    %c0_i32 = arith.constant 0 : i32
    %c0_i32_0 = arith.constant 0 : i32
    %c0_i32_1 = arith.constant 0 : i32
    return %c0_i32, %c0_i32_0 : i32, i32
  }
  func.func @transform_9(%arg0: i32) -> (i32, i32, i32) {
    %c0_i32 = arith.constant 0 : i32
    %c0_i32_0 = arith.constant 0 : i32
    %c0_i32_1 = arith.constant 0 : i32
    return %arg0, %c0_i32, %c0_i32_0 : i32, i32, i32
  }
}

</mosaic_0001>

<bundles_post_ra>
// kernel: refinement_forward.1
= control target key start
LH: loop header
LB: loop body
LE: loop exit
PB: predicated region body
PF: predicated region fallthrough
CT: control target
= control target key end

     0   :  { %14 = vsyncpa [#allocation4], 0  ;;  %s3612_s0 = inlined_call_operand.vmem [shape: f32[2,48,96], index: 0, kind: input, shape index: {}]   ;;  %s3613_s1 = inlined_call_operand.vmem [shape: f32[32,48], index: 1, kind: input, shape index: {}]   ;;  %s3614_s2 = inlined_call_operand.vmem [shape: f32[32,1], index: 2, kind: input, shape index: {}]   ;;  %s3615_s3 = inlined_call_operand.vmem [shape: f32[9,32,32], index: 3, kind: input, shape index: {}]   ;;  %s3616_s4 = inlined_call_operand.vmem [shape: f32[3,32,1], index: 4, kind: input, shape index: {}]   ;;  %s3617_s5 = inlined_call_operand.vmem [shape: f32[3,32,32], index: 5, kind: input, shape index: {}]   ;;  %s3618_s6 = inlined_call_operand.vmem [shape: f32[3,32,1], index: 6, kind: input, shape index: {}]   ;;  %s3619_s7 = inlined_call_operand.vmem [shape: f32[16,32], index: 7, kind: input, shape index: {}]   ;;  %s3620_s8 = inlined_call_operand.vmem [shape: f32[16,1], index: 8, kind: input, shape index: {}]   ;;  %s3621_s9 = inlined_call_operand.hbm [shape: f32[2,16,96], index: 9, kind: output, shape index: {}]  }
   0x1   :  { %16 = vsyncpa [#allocation4 + $0x1], 0  ;;  %s3085_s30 = smov 0   ;;  %s3087_s10 = smov 0  }
   0x2   :  { %s3089_s11 = smov 0   ;;  %s3091_s12 = smov 0  }
   0x3 LB: > { %s3106_s13 = sadd.s32 4294967295, %s3022_s12   ;;  %s2247_s14 = sadd.s32 4294967294, %s3022_s12   ;;  %s3022_s12 = sphi %s3091_s12, %s3627_s12   ;;  %s3018_s11 = sphi %s3089_s11, %s3626_s11   ;;  %s3014_s10 = sphi %s3087_s10, %s3625_s10   ;;  %s3010_s30 = sphi %s3085_s30, %s3624_s30  }
   0x4   : > { %s3110_s15 = sadd.s32 1, %s3022_s12   ;;  %s223_s16 = sadd.s32 1, %s3018_s11 }
   0x5   : > { %s220_s17 = ssub.s32 %s3022_s12, %s3110_s15  ;;  %p233_p0 = scmp.ne.s32.totalorder %s3018_s11, %s3014_s10 }
   0x6   : > { %p221_p1 = scmp.eq.s32.totalorder %s220_s17, 0  ;;  %p234_p2 = scmp.eq.s32.totalorder %s3106_s13, 1 }
   0x7   : > { %p239_p3 = scmp.ne.s32.totalorder %s3014_s10, %s3010_s30  ;;  %p240_p4 = scmp.eq.s32.totalorder %s2247_s14, 1 }
   0x8   : > { %s3121_s18 = scalar_select %p221_p1, %s3018_s11, %s223_s16  }
   0x9   : > { %p3123_p5 = por %p234_p2, %p233_p0  ;;  %p3127_p6 = por %p240_p4, %p239_p3 }
   0xa   : > { %p2250_p7 = scmp.ge.s32.totalorder %s3022_s12, 1  ;;  %p290_p8 = scmp.lt.s32.totalorder %s3022_s12, 3 }
   0xc   : > { %p291_p9 = pnand %p2250_p7, %p290_p8 }
   0xd   : > { %p326_p10 = scmp.lt.s32.totalorder (!%p291_p9), %s3106_s13, 1  ;;  %v331_v0 = vld [vmem:[%s3613_s1] sm:$0xff] (!%p291_p9)  ;;  %vm365_vm0 = vcmask (!%p291_p9), 392192   ;;  %v3024_v1 = vmov (!%p291_p9), 0   ;;  %v343_v3 = vld [vmem:[%s3614_s2 + $0x10] sm:$0xff] (!%p291_p9)  ;;  %v342_v4 = vld [vmem:[%s3614_s2 + $0x8] sm:$0xff] (!%p291_p9) }
   0xe   : > { %294 = sbr.rel (%p291_p9) target bundleno = 2274 (0x8e2), region = 56  ;;  %2493 = vmatprep.mubr.msk.f32.mxu0 (!%p291_p9), %vm365_vm0, %v331_v0  ;;  %2868 = vset.pattern.permute.xlu0 (!%p291_p9), %v3024_v1  ;;  %v341_v2 = vld [vmem:[%s3614_s2] sm:$0xff] (!%p291_p9)  ;;  %v344_v5 = vld [vmem:[%s3614_s2 + $0x18] sm:$0xff] (!%p291_p9)  ;;  %v332_v15 = vld [vmem:[%s3613_s1 + $0x8] sm:$0xff] (!%p291_p9)  ;;  %vm465_vm1 = vcmask (!%p291_p9), 785408   ;;  %v3025_v18 = vmov (!%p291_p9), 0.0  }
   0xf   : > { %347 = vperm.xlu0 (!%p291_p9), %2868, %v341_v2   ;;  %2869 = vset.pattern.permute.xlu1 (!%p291_p9), %v3024_v1  ;;  %v333_v16 = vld [vmem:[%s3613_s1 + $0x10] sm:$0xff] (!%p291_p9)  ;;  %v334_v17 = vld [vmem:[%s3613_s1 + $0x18] sm:$0xff] (!%p291_p9)  ;;  %468 = vst [vmem:[#allocation2 + $0x20] sm:$0xff] (!%p291_p9), %v3025_v18  ;;  %464 = vst [vmem:[#allocation2 + $0x8] sm:$0xff] (!%p291_p9), %v3025_v18  ;;  %vm497_vm2 = vcmask (!%p291_p9), 261120   ;;  %s3026_s17 = smov (!%p291_p9), 1  }
  0x10   : > { %357 = vperm.xlu1 (!%p291_p9), %2869, %v343_v3   ;;  %471 = vst [vmem:[#allocation2 + $0x38] sm:$0xff] (!%p291_p9), %v3025_v18  ;;  %474 = vst [vmem:[#allocation2 + $0x50] sm:$0xff] (!%p291_p9), %v3025_v18  ;;  %v2257_v28 = vld [vmem:[%s3615_s3 + $0x20] sm:$0xff] (!%p291_p9)  ;;  %v2258_v43 = vld [vmem:[%s3615_s3 + $0x28] sm:$0xff] (!%p291_p9)  ;;  %s3027_s25 = smov (!%p291_p9), 127   ;;  %vm619_vm3 = vcmask (!%p291_p9), 7168  }
  0x11   : > { %2507 = vmatprep.mubr.msk.f32.mxu1 (!%p291_p9), %vm497_vm2, %v2257_v28  ;;  %v2259_v45 = vld [vmem:[%s3615_s3 + $0x30] sm:$0xff] (!%p291_p9)  ;;  %v844_v46 = vld [vmem:[%s3616_s4 + $0x8] sm:$0xff] (!%p291_p9)  ;;  %v843_v47 = vld [vmem:[%s3616_s4] sm:$0xff] (!%p291_p9)  ;;  %s3028_s22 = smov (!%p291_p9), 2   ;;  %vm1147_vm4 = vcmask (!%p291_p9), 15360   ;;  %s3030_s24 = smov (!%p291_p9), 4  }
  0x12   : > { %v2260_v48 = vld [vmem:[%s3615_s3 + $0x38] sm:$0xff] (!%p291_p9)  ;;  %v488_v49 = vld [vmem:[%s3615_s3] sm:$0xff] (!%p291_p9)  ;;  %v845_v51 = vld [vmem:[%s3616_s4 + $0x10] sm:$0xff] (!%p291_p9)  ;;  %s3031_s29 = smov (!%p291_p9), 124   ;;  %vm1678_vm5 = vcmask (!%p291_p9), 31744  }
  0x13   : > { %352 = vperm.xlu0 (!%p291_p9), %2868, %v342_v4   ;;  %v846_v50 = vld [vmem:[%s3616_s4 + $0x18] sm:$0xff] (!%p291_p9)  ;;  %v880_v52 = vld [vmem:[%s3618_s6 + $0x8] sm:$0xff] (!%p291_p9)  ;;  %v879_v53 = vld [vmem:[%s3618_s6] sm:$0xff] (!%p291_p9) }
  0x14   : > { %362 = vperm.xlu1 (!%p291_p9), %2869, %v344_v5   ;;  %v882_v54 = vld [vmem:[%s3618_s6 + $0x18] sm:$0xff] (!%p291_p9)  ;;  %v881_v55 = vld [vmem:[%s3618_s6 + $0x10] sm:$0xff] (!%p291_p9) }
  0x15   : > { %s327_s27 = scalar_select %p326_p10, %s3106_s13, 1 }
  0x17   : > { %s2818_s14 = smul.u32 48, %s327_s27  ;;  %s3029_s27 = smov 126  }
  0x19   : > { %s330_s23 = scalar_lea.vmem %s3612_s0, %s2818_s14 }
  0x1a   : > { %v335_v6 = vld [vmem:[%s330_s23] sm:$0xff]  ;;  %v336_v7 = vld [vmem:[%s330_s23 + $0x8] sm:$0xff]  ;;  %v337_v8 = vld [vmem:[%s330_s23 + $0x10] sm:$0xff] }
  0x1b   : > { %v2678_v9 = vpack.c.bf16 %v336_v7, %v335_v6  ;;  %v338_v10 = vld [vmem:[%s330_s23 + $0x18] sm:$0xff]  ;;  %v339_v12 = vld [vmem:[%s330_s23 + $0x20] sm:$0xff]  ;;  %v340_v13 = vld [vmem:[%s330_s23 + $0x28] sm:$0xff] }
  0x1c   : > { %v2682_v11 = vpack.c.bf16 %v338_v10, %v337_v8  ;;  %v2686_v14 = vpack.c.bf16 %v340_v13, %v339_v12 }
  0x1d   : > { %2679 = vmatprep.subr.bf16.mxu0 %v2678_v9 }
  0x1e   : > { %2681 = vmatpush3.bf16.msra.mxu0 %v2678_v9 }
  0x1f   : > { %2683 = vmatprep.subr.bf16.mxu0 %v2682_v11 }
  0x22   : > { %2685 = vmatpush3.bf16.msra.mxu0 %v2682_v11 }
  0x23   : > { %2687 = vmatprep.subr.bf16.mxu0 %v2686_v14 }
  0x26   : > { %2689 = vmatpush3.bf16.msra.mxu0 %v2686_v14 }
  0x29   : > { %2494 = vmatmul.mubr.msk.f32.vlgmr.msra.gmra.mrb[0].mxu0 %vm365_vm0, %v332_v15 }
  0x2a   : > { %2496 = vmatprep.mubr.msk.f32.mxu0 %vm365_vm0, %v333_v16 }
  0x2d   : > { %2497 = vmatmul.mubr.msk.f32.gmra.mrb[2].mxu0 %vm365_vm0, %v334_v17  ;;  %v489_v17 = vld [vmem:[%s3615_s3 + $0x8] sm:$0xff] }
  0x8e   : > { %v348_v19 = vpop.permute.xlu0 %347 }
  0x8f   : > { %v358_v20 = vpop.permute.xlu1 %357 }
  0x92   : > { %v353_v21 = vpop.permute.xlu0 %352 }
  0x93   : > { %v363_v26 = vpop.permute.xlu1 %362 }
  0xfc   : > { %v2495_v22 = vpop.f32.mrb[0].mxu0 }
  0xfd   : > { %v450_v23 = vadd.f32 %v2495_v22, %v353_v21  ;;  %v444_v24 = vpop.f32.mrb[1].mxu0  ;;  %v491_v21 = vld [vmem:[%s3615_s3 + $0x18] sm:$0xff]  ;;  %v2269_v22 = vld [vmem:[%s3615_s3 + $0x40] sm:$0xff] }
  0xfe   : > { %v445_v25 = vadd.f32 %v444_v24, %v348_v19  ;;  %v490_v19 = vld [vmem:[%s3615_s3 + $0x10] sm:$0xff] }
  0xff   : > { %477 = vst.msk [vmem:[#allocation2 + $0x20] sm:$0xff] %vm465_vm1, %v450_v23  ;;  %v2270_v23 = vld [vmem:[%s3615_s3 + $0x48] sm:$0xff]  ;;  %v2271_v24 = vld [vmem:[%s3615_s3 + $0x50] sm:$0xff] }
 0x100   : > { %476 = vst.msk [vmem:[#allocation2 + $0x8] sm:$0xff] %vm465_vm1, %v445_v25  ;;  %v2498_v27 = vpop.f32.mrb[2].mxu0  ;;  %v2272_v25 = vld [vmem:[%s3615_s3 + $0x58] sm:$0xff] }
 0x101   : > { %v460_v29 = vadd.f32 %v2498_v27, %v363_v26  ;;  %v454_v30 = vpop.f32.mrb[3].mxu0  ;;  %v875_v26 = vld [vmem:[%s3617_s5] sm:$0xff] }
 0x102   : > { %v455_v31 = vadd.f32 %v454_v30, %v358_v20  ;;  %2549 = vmatprep.mubr.msk.f32.mxu0 %vm497_vm2, %v875_v26 }
 0x103   : > { %479 = vst.msk [vmem:[#allocation2 + $0x50] sm:$0xff] %vm465_vm1, %v460_v29 }
 0x104   : > { %478 = vst.msk [vmem:[#allocation2 + $0x38] sm:$0xff] %vm465_vm1, %v455_v31 }
 0x106   : > { %v3178_v32 = vld [vmem:[#allocation2 + $0x20] sm:$0xff] }
 0x107   : > { %v2870_v33 = vpack.i.bf16 %v3178_v32, %v3025_v18  ;;  %v3182_v34 = vld [vmem:[#allocation2 + $0x8] sm:$0xff] }
 0x108   : > { %v2875_v35 = vpack.i.bf16 %v3182_v34, %v3025_v18  ;;  %v2690_v36 = vpack.c.bf16 %v3178_v32, %v3182_v34  ;;  %v2890_v44 = vpack.i.bf16 %v3178_v32, %v3182_v34 }
 0x109   : > { %2871 = vrot.lane.b32.xlu1 %v2870_v33, %s3026_s17 }
 0x10a   : > { %2876 = vrot.lane.b32.xlu0 %v2875_v35, %s3026_s17  ;;  %2691 = vmatprep.subr.bf16.mxu1 %v2690_v36  ;;  %v3188_v37 = vld [vmem:[#allocation2 + $0x50] sm:$0xff] }
 0x10b   : > { %2693 = vmatpush3.bf16.msra.mxu1 %v2690_v36  ;;  %v2885_v38 = vpack.i.bf16 %v3188_v37, %v3025_v18  ;;  %v3192_v39 = vld [vmem:[#allocation2 + $0x38] sm:$0xff] }
 0x10c   : > { %v2880_v40 = vpack.i.bf16 %v3192_v39, %v3025_v18  ;;  %v2694_v41 = vpack.c.bf16 %v3188_v37, %v3192_v39  ;;  %v2895_v42 = vpack.i.bf16 %v3188_v37, %v3192_v39 }
 0x10d   : > { %2886 = vrot.lane.b32.xlu1 %v2885_v38, %s3026_s17 }
 0x10e   : > { %2881 = vrot.lane.b32.xlu0 %v2880_v40, %s3026_s17  ;;  %2695 = vmatprep.subr.bf16.mxu1 %v2694_v41  ;;  %s323_s17 = sand.u32 1, %s3014_s10  }
 0x10f   : > { %2697 = vmatpush3.bf16.msra.mxu1 %v2694_v41  ;;  %s2251_s21 = sshll.u32 %s323_s17, 4 }
 0x111   : > { %2896 = vrot.lane.b32.xlu1 %v2895_v42, %s3027_s25 }
 0x112   : > { %2891 = vrot.lane.b32.xlu0 %v2890_v44, %s3027_s25  ;;  %2508 = vmatmul.mubr.msk.f32.vlgmr.msra.gmra.mrb[0].mxu1 %vm497_vm2, %v2258_v43 }
 0x113   : > { %2510 = vmatprep.mubr.msk.f32.mxu1 %vm497_vm2, %v2259_v45 }
 0x115   : > { %854 = vperm.xlu1 %2869, %v844_v46  }
 0x116   : > { %849 = vperm.xlu0 %2868, %v843_v47   ;;  %2511 = vmatmul.mubr.msk.f32.gmra.mrb[2].mxu1 %vm497_vm2, %v2260_v48 }
 0x117   : > { %2521 = vmatprep.mubr.msk.f32.mxu1 %vm497_vm2, %v488_v49  ;;  %v876_v49 = vld [vmem:[%s3617_s5 + $0x8] sm:$0xff] }
 0x119   : > { %864 = vperm.xlu1 %2869, %v846_v50   ;;  %v877_v50 = vld [vmem:[%s3617_s5 + $0x10] sm:$0xff] }
 0x11a   : > { %859 = vperm.xlu0 %2868, %v845_v51   ;;  %v878_v51 = vld [vmem:[%s3617_s5 + $0x18] sm:$0xff] }
 0x11d   : > { %890 = vperm.xlu1 %2869, %v880_v52  }
 0x11e   : > { %885 = vperm.xlu0 %2868, %v879_v53  }
 0x121   : > { %900 = vperm.xlu1 %2869, %v882_v54  }
 0x122   : > { %895 = vperm.xlu0 %2868, %v881_v55  }
 0x17b   : > { %v2872_v56 = vpop.permute.xlu1 %2871 }
 0x17c   : > { %v2874_v57 = vunpack.i.h.bf16 %v2872_v56  ;;  %v2873_v58 = vunpack.i.l.bf16 %v2872_v56  ;;  %v2877_v59 = vpop.permute.xlu0 %2876 }
 0x17d   : > { %v2879_v60 = vunpack.i.h.bf16 %v2877_v59  ;;  %v2878_v61 = vunpack.i.l.bf16 %v2877_v59 }
 0x17e   : > { %v621_v62 = vsel %vm619_vm3, %v2873_v58, %v2874_v57 }
 0x17f   : > { %v2887_v63 = vpop.permute.xlu1 %2886  ;;  %v620_v0 = vsel %vm619_vm3, %v2878_v61, %v2879_v60 }
 0x180   : > { %v2889_v1 = vunpack.i.h.bf16 %v2887_v63  ;;  %v2888_v2 = vunpack.i.l.bf16 %v2887_v63  ;;  %v2882_v3 = vpop.permute.xlu0 %2881  ;;  %v2698_v4 = vpack.c.bf16 %v621_v62, %v620_v0 }
 0x181   : > { %v2884_v5 = vunpack.i.h.bf16 %v2882_v3  ;;  %v2883_v6 = vunpack.i.l.bf16 %v2882_v3 }
 0x182   : > { %2699 = vmatprep.subr.bf16.mxu1 %v2698_v4  ;;  %v623_v7 = vsel %vm619_vm3, %v2888_v2, %v2889_v1  ;;  %v2285_v2 = vld [vmem:[%s3615_s3 + $0x80] sm:$0xff] }
 0x183   : > { %v2897_v8 = vpop.permute.xlu1 %2896  ;;  %2701 = vmatpush3.bf16.msra.mxu1 %v2698_v4  ;;  %v622_v9 = vsel %vm619_vm3, %v2883_v6, %v2884_v5 }
 0x184   : > { %v2892_v10 = vpop.permute.xlu0 %2891  ;;  %v2702_v11 = vpack.c.bf16 %v623_v7, %v622_v9  ;;  %v2899_v14 = vunpack.i.h.bf16 %v2897_v8  ;;  %v2898_v15 = vunpack.i.l.bf16 %v2897_v8 }
 0x185   : > { %v2894_v12 = vunpack.i.h.bf16 %v2892_v10  ;;  %v2893_v13 = vunpack.i.l.bf16 %v2892_v10 }
 0x186   : > { %2703 = vmatprep.subr.bf16.mxu1 %v2702_v11  ;;  %v2710_v20 = vpack.c.bf16 %v2899_v14, %v2898_v15  ;;  %v2287_v14 = vld [vmem:[%s3615_s3 + $0x90] sm:$0xff]  ;;  %v2306_v15 = vld [vmem:[%s3616_s4 + $0x28] sm:$0xff] }
 0x187   : > { %v2706_v16 = vpack.c.bf16 %v2894_v12, %v2893_v13  ;;  %2705 = vmatpush3.bf16.msra.mxu1 %v2702_v11  ;;  %v2286_v12 = vld [vmem:[%s3615_s3 + $0x88] sm:$0xff] }
 0x189   : > { %2707 = vmatprep.subr.bf16.mxu1 %v2706_v16 }
 0x18a   : > { %2522 = vmatmul.mubr.msk.f32.vlgmr.msra.gmra.mrb[0].mxu1 %vm497_vm2, %v489_v17  ;;  %v2288_v17 = vld [vmem:[%s3615_s3 + $0x98] sm:$0xff] }
 0x18b   : > { %2709 = vmatpush3.bf16.msra.mxu1 %v2706_v16  ;;  %2524 = vmatprep.mubr.msk.f32.mxu1 %vm497_vm2, %v490_v19  ;;  %v2305_v16 = vld [vmem:[%s3616_s4 + $0x20] sm:$0xff] }
 0x18c   : > { %2711 = vmatprep.subr.bf16.mxu1 %v2710_v20  ;;  %v2281_v19 = vld [vmem:[%s3615_s3 + $0x60] sm:$0xff] }
 0x18e   : > { %2525 = vmatmul.mubr.msk.f32.gmra.mrb[2].mxu1 %vm497_vm2, %v491_v21  ;;  %v2307_v21 = vld [vmem:[%s3616_s4 + $0x30] sm:$0xff] }
 0x18f   : > { %2713 = vmatpush3.bf16.msra.mxu1 %v2710_v20  ;;  %2535 = vmatprep.mubr.msk.f32.mxu1 %vm497_vm2, %v2269_v22  ;;  %v2308_v20 = vld [vmem:[%s3616_s4 + $0x38] sm:$0xff]  ;;  %v2314_v22 = vld [vmem:[%s3618_s6 + $0x28] sm:$0xff] }
 0x192   : > { %2536 = vmatmul.mubr.msk.f32.vlgmr.msra.gmra.mrb[0].mxu1 %vm497_vm2, %v2270_v23  ;;  %v2313_v23 = vld [vmem:[%s3618_s6 + $0x20] sm:$0xff] }
 0x193   : > { %2538 = vmatprep.mubr.msk.f32.mxu1 %vm497_vm2, %v2271_v24  ;;  %v2316_v24 = vld [vmem:[%s3618_s6 + $0x38] sm:$0xff] }
 0x194   : > { %v855_v27 = vpop.permute.xlu1 %854 }
 0x195   : > { %v850_v28 = vpop.permute.xlu0 %849 }
 0x196   : > { %2539 = vmatmul.mubr.msk.f32.gmra.mrb[2].mxu1 %vm497_vm2, %v2272_v25  ;;  %v2315_v25 = vld [vmem:[%s3618_s6 + $0x30] sm:$0xff] }
 0x198   : > { %v865_v36 = vpop.permute.xlu1 %864 }
 0x199   : > { %v860_v41 = vpop.permute.xlu0 %859 }
 0x19c   : > { %v891_v52 = vpop.permute.xlu1 %890 }
 0x19d   : > { %v886_v53 = vpop.permute.xlu0 %885 }
 0x1a0   : > { %v901_v59 = vpop.permute.xlu1 %900 }
 0x1a1   : > { %v896_v62 = vpop.permute.xlu0 %895 }
 0x265   : > { %v2537_v29 = vpop.f32.mrb[0].mxu1 }
 0x266   : > { %v868_v30 = vadd.f32 %v2537_v29, %v855_v27  ;;  %v820_v31 = vpop.f32.mrb[1].mxu1 }
 0x267   : > { %v867_v33 = vadd.f32 %v850_v28, %v820_v31 }
 0x268   : > { %v872_v35 = vmax.f32 %v868_v30, 0.0 }
 0x269   : > { %v871_v38 = vmax.f32 %v867_v33, 0.0  ;;  %v2540_v40 = vpop.f32.mrb[2].mxu1 }
 0x26a   : > { %v870_v42 = vadd.f32 %v2540_v40, %v865_v36  ;;  %v830_v43 = vpop.f32.mrb[3].mxu1 }
 0x26b   : > { %v2714_v44 = vpack.c.bf16 %v872_v35, %v871_v38  ;;  %v869_v45 = vadd.f32 %v860_v41, %v830_v43 }
 0x26c   : > { %v874_v46 = vmax.f32 %v870_v42, 0.0 }
 0x26d   : > { %v873_v47 = vmax.f32 %v869_v45, 0.0  ;;  %2715 = vmatprep.subr.bf16.mxu0 %v2714_v44 }
 0x26e   : > { %2717 = vmatpush3.bf16.msra.mxu0 %v2714_v44 }
 0x26f   : > { %v2718_v48 = vpack.c.bf16 %v874_v46, %v873_v47 }
 0x271   : > { %2719 = vmatprep.subr.bf16.mxu0 %v2718_v48 }
 0x272   : > { %2721 = vmatpush3.bf16.msra.mxu0 %v2718_v48 }
 0x275   : > { %2550 = vmatmul.mubr.msk.f32.vlgmr.msra.gmra.mrb[4].mxu0 %vm497_vm2, %v876_v49 }
 0x276   : > { %2552 = vmatprep.mubr.msk.f32.mxu0 %vm497_vm2, %v877_v50 }
 0x279   : > { %2553 = vmatmul.mubr.msk.f32.gmra.mrb[6].mxu0 %vm497_vm2, %v878_v51 }
 0x27a   : > { %2563 = vmatprep.mubr.msk.f32.mxu0 %vm497_vm2, %v2285_v2 }
 0x348   : > { %v2551_v54 = vpop.f32.mrb[4].mxu0 }
 0x349   : > { %v987_v55 = vadd.f32 %v2551_v54, %v891_v52  ;;  %v981_v56 = vpop.f32.mrb[5].mxu0 }
 0x34a   : > { %v982_v57 = vadd.f32 %v981_v56, %v886_v53  ;;  %v2283_v56 = vld [vmem:[%s3615_s3 + $0x70] sm:$0xff] }
 0x34b   : > { %v1001_v58 = vadd.f32 %v987_v55, %v3178_v32  ;;  %v2282_v55 = vld [vmem:[%s3615_s3 + $0x68] sm:$0xff] }
 0x34c   : > { %v1000_v60 = vadd.f32 %v982_v57, %v3182_v34  ;;  %v2554_v61 = vpop.f32.mrb[6].mxu0 }
 0x34d   : > { %1005 = vst.msk [vmem:[#allocation2 + $0x20] sm:$0xff] %vm465_vm1, %v1001_v58  ;;  %v997_v63 = vadd.f32 %v2554_v61, %v901_v59  ;;  %v991_v0 = vpop.f32.mrb[7].mxu0  ;;  %v2284_v58 = vld [vmem:[%s3615_s3 + $0x78] sm:$0xff]  ;;  %v2297_v59 = vld [vmem:[%s3615_s3 + $0xa0] sm:$0xff]  ;;  %v2299_v61 = vld [vmem:[%s3615_s3 + $0xb0] sm:$0xff] }
 0x34e   : > { %1004 = vst.msk [vmem:[#allocation2 + $0x8] sm:$0xff] %vm465_vm1, %v1000_v60  ;;  %v992_v1 = vadd.f32 %v991_v0, %v896_v62  ;;  %v2298_v60 = vld [vmem:[%s3615_s3 + $0xa8] sm:$0xff]  ;;  %v2300_v62 = vld [vmem:[%s3615_s3 + $0xb8] sm:$0xff] }
 0x34f   : > { %v1003_v3 = vadd.f32 %v997_v63, %v3188_v37  ;;  %v2309_v63 = vld [vmem:[%s3617_s5 + $0x20] sm:$0xff] }
 0x350   : > { %v1002_v32 = vadd.f32 %v992_v1, %v3192_v39  ;;  %2605 = vmatprep.mubr.msk.f32.mxu1 %vm497_vm2, %v2309_v63  ;;  %v2076_v63 = vld [vmem:[%s3620_s8] sm:$0xff] }
 0x351   : > { %1007 = vst.msk [vmem:[#allocation2 + $0x50] sm:$0xff] %vm465_vm1, %v1003_v3 }
 0x352   : > { %1006 = vst.msk [vmem:[#allocation2 + $0x38] sm:$0xff] %vm465_vm1, %v1002_v32 }
 0x354   : > { %v3302_v34 = vld [vmem:[#allocation2 + $0x20] sm:$0xff] }
 0x355   : > { %v2900_v4 = vpack.i.bf16 %v3302_v34, %v3025_v18  ;;  %v3306_v5 = vld [vmem:[#allocation2 + $0x8] sm:$0xff] }
 0x356   : > { %v2905_v6 = vpack.i.bf16 %v3306_v5, %v3025_v18  ;;  %v2722_v37 = vpack.c.bf16 %v3302_v34, %v3306_v5  ;;  %v2920_v13 = vpack.i.bf16 %v3302_v34, %v3306_v5 }
 0x357   : > { %2901 = vrot.lane.b32.xlu1 %v2900_v4, %s3028_s22 }
 0x358   : > { %2906 = vrot.lane.b32.xlu0 %v2905_v6, %s3028_s22  ;;  %2723 = vmatprep.subr.bf16.mxu0 %v2722_v37  ;;  %v3312_v39 = vld [vmem:[#allocation2 + $0x50] sm:$0xff] }
 0x359   : > { %2725 = vmatpush3.bf16.msra.mxu0 %v2722_v37  ;;  %v2915_v7 = vpack.i.bf16 %v3312_v39, %v3025_v18  ;;  %v3316_v8 = vld [vmem:[#allocation2 + $0x38] sm:$0xff] }
 0x35a   : > { %v2910_v9 = vpack.i.bf16 %v3316_v8, %v3025_v18  ;;  %v2726_v10 = vpack.c.bf16 %v3312_v39, %v3316_v8  ;;  %v2925_v11 = vpack.i.bf16 %v3312_v39, %v3316_v8 }
 0x35b   : > { %2916 = vrot.lane.b32.xlu1 %v2915_v7, %s3028_s22 }
 0x35c   : > { %2911 = vrot.lane.b32.xlu0 %v2910_v9, %s3028_s22  ;;  %2727 = vmatprep.subr.bf16.mxu0 %v2726_v10  ;;  %s325_s22 = scalar_lea.vmem [#allocation3], %s2251_s21 }
 0x35d   : > { %2729 = vmatpush3.bf16.msra.mxu0 %v2726_v10  ;;  %s2185_s23 = sshll.u32 %s325_s22, 4  ;;  %s3562_s23 = int_to_ptr.vmem [resolvable:$true] %s2185_s23 }
 0x35e   : > { %s2960_s28 = scalar_lea.vmem %s3562_s23, 256 }
 0x35f   : > { %2926 = vrot.lane.b32.xlu1 %v2925_v11, %s3029_s27  ;;  %p2961_p11 = scmp.ne.s32.totalorder %s3562_s23, %s2960_s28 }
 0x360   : > { %2921 = vrot.lane.b32.xlu0 %v2920_v13, %s3029_s27  ;;  %2564 = vmatmul.mubr.msk.f32.vlgmr.msra.gmra.mrb[8].mxu0 %vm497_vm2, %v2286_v12 }
 0x361   : > { %2566 = vmatprep.mubr.msk.f32.mxu0 %vm497_vm2, %v2287_v14  ;;  %p2962_p12 = pnand %p2961_p11, %p3123_p5 }
 0x363   : > { %1383 = vperm.xlu1 %2869, %v2306_v15   ;;  %p2963_p13 = pneg %p2962_p12 }
 0x364   : > { %1378 = vperm.xlu0 %2868, %v2305_v16   ;;  %2567 = vmatmul.mubr.msk.f32.gmra.mrb[10].mxu0 %vm497_vm2, %v2288_v17 }
 0x365   : > { %2577 = vmatprep.mubr.msk.f32.mxu0 %vm497_vm2, %v2281_v19  ;;  %v2310_v19 = vld [vmem:[%s3617_s5 + $0x28] sm:$0xff] }
 0x367   : > { %1393 = vperm.xlu1 %2869, %v2308_v20   ;;  %v2311_v20 = vld [vmem:[%s3617_s5 + $0x30] sm:$0xff] }
 0x368   : > { %1388 = vperm.xlu0 %2868, %v2307_v21   ;;  %v2312_v21 = vld [vmem:[%s3617_s5 + $0x38] sm:$0xff] }
 0x36b   : > { %1421 = vperm.xlu1 %2869, %v2314_v22  }
 0x36c   : > { %1416 = vperm.xlu0 %2868, %v2313_v23  }
 0x36f   : > { %1431 = vperm.xlu1 %2869, %v2316_v24  }
 0x370   : > { %1426 = vperm.xlu0 %2868, %v2315_v25  }
 0x3c9   : > { %v2902_v26 = vpop.permute.xlu1 %2901 }
 0x3ca   : > { %v2904_v27 = vunpack.i.h.bf16 %v2902_v26  ;;  %v2903_v28 = vunpack.i.l.bf16 %v2902_v26  ;;  %v2907_v29 = vpop.permute.xlu0 %2906 }
 0x3cb   : > { %v2909_v30 = vunpack.i.h.bf16 %v2907_v29  ;;  %v2908_v31 = vunpack.i.l.bf16 %v2907_v29 }
 0x3cc   : > { %v1149_v33 = vsel %vm1147_vm4, %v2903_v28, %v2904_v27 }
 0x3cd   : > { %v2917_v35 = vpop.permute.xlu1 %2916  ;;  %v1148_v36 = vsel %vm1147_vm4, %v2908_v31, %v2909_v30 }
 0x3ce   : > { %v2919_v38 = vunpack.i.h.bf16 %v2917_v35  ;;  %v2918_v40 = vunpack.i.l.bf16 %v2917_v35  ;;  %v2912_v41 = vpop.permute.xlu0 %2911  ;;  %v2730_v42 = vpack.c.bf16 %v1149_v33, %v1148_v36 }
 0x3cf   : > { %v2914_v43 = vunpack.i.h.bf16 %v2912_v41  ;;  %v2913_v44 = vunpack.i.l.bf16 %v2912_v41 }
 0x3d0   : > { %2731 = vmatprep.subr.bf16.mxu0 %v2730_v42  ;;  %v1151_v45 = vsel %vm1147_vm4, %v2918_v40, %v2919_v38  ;;  %v2325_v40 = vld [vmem:[%s3615_s3 + $0xe0] sm:$0xff] }
 0x3d1   : > { %v2927_v46 = vpop.permute.xlu1 %2926  ;;  %2733 = vmatpush3.bf16.msra.mxu0 %v2730_v42  ;;  %v1150_v47 = vsel %vm1147_vm4, %v2913_v44, %v2914_v43 }
 0x3d2   : > { %v2922_v48 = vpop.permute.xlu0 %2921  ;;  %v2734_v49 = vpack.c.bf16 %v1151_v45, %v1150_v47  ;;  %v2929_v52 = vunpack.i.h.bf16 %v2927_v46  ;;  %v2928_v53 = vunpack.i.l.bf16 %v2927_v46 }
 0x3d3   : > { %v2924_v50 = vunpack.i.h.bf16 %v2922_v48  ;;  %v2923_v51 = vunpack.i.l.bf16 %v2922_v48 }
 0x3d4   : > { %2735 = vmatprep.subr.bf16.mxu0 %v2734_v49  ;;  %v2742_v57 = vpack.c.bf16 %v2929_v52, %v2928_v53  ;;  %v2346_v52 = vld [vmem:[%s3616_s4 + $0x48] sm:$0xff]  ;;  %v2345_v53 = vld [vmem:[%s3616_s4 + $0x40] sm:$0xff] }
 0x3d5   : > { %v2738_v54 = vpack.c.bf16 %v2924_v50, %v2923_v51  ;;  %2737 = vmatpush3.bf16.msra.mxu0 %v2734_v49  ;;  %v2326_v50 = vld [vmem:[%s3615_s3 + $0xe8] sm:$0xff] }
 0x3d7   : > { %2739 = vmatprep.subr.bf16.mxu0 %v2738_v54 }
 0x3d8   : > { %2578 = vmatmul.mubr.msk.f32.vlgmr.msra.gmra.mrb[8].mxu0 %vm497_vm2, %v2282_v55  ;;  %v2321_v55 = vld [vmem:[%s3615_s3 + $0xc0] sm:$0xff] }
 0x3d9   : > { %2741 = vmatpush3.bf16.msra.mxu0 %v2738_v54  ;;  %2580 = vmatprep.mubr.msk.f32.mxu0 %vm497_vm2, %v2283_v56  ;;  %v2328_v54 = vld [vmem:[%s3615_s3 + $0xf8] sm:$0xff] }
 0x3da   : > { %2743 = vmatprep.subr.bf16.mxu0 %v2742_v57  ;;  %v2348_v56 = vld [vmem:[%s3616_s4 + $0x58] sm:$0xff] }
 0x3dc   : > { %2581 = vmatmul.mubr.msk.f32.gmra.mrb[10].mxu0 %vm497_vm2, %v2284_v58  ;;  %v2354_v58 = vld [vmem:[%s3618_s6 + $0x48] sm:$0xff] }
 0x3dd   : > { %2745 = vmatpush3.bf16.msra.mxu0 %v2742_v57  ;;  %2591 = vmatprep.mubr.msk.f32.mxu0 %vm497_vm2, %v2297_v59  ;;  %v2347_v57 = vld [vmem:[%s3616_s4 + $0x50] sm:$0xff]  ;;  %v2353_v59 = vld [vmem:[%s3618_s6 + $0x40] sm:$0xff] }
 0x3e0   : > { %2592 = vmatmul.mubr.msk.f32.vlgmr.msra.gmra.mrb[8].mxu0 %vm497_vm2, %v2298_v60  ;;  %v2356_v60 = vld [vmem:[%s3618_s6 + $0x58] sm:$0xff] }
 0x3e1   : > { %2594 = vmatprep.mubr.msk.f32.mxu0 %vm497_vm2, %v2299_v61  ;;  %v2355_v61 = vld [vmem:[%s3618_s6 + $0x50] sm:$0xff] }
 0x3e2   : > { %v1384_v0 = vpop.permute.xlu1 %1383 }
 0x3e3   : > { %v1379_v1 = vpop.permute.xlu0 %1378 }
 0x3e4   : > { %2595 = vmatmul.mubr.msk.f32.gmra.mrb[10].mxu0 %vm497_vm2, %v2300_v62  ;;  %v2077_v62 = vld [vmem:[%s3620_s8 + $0x8] sm:$0xff] }
 0x3e6   : > { %v1394_v37 = vpop.permute.xlu1 %1393 }
 0x3e7   : > { %v1389_v10 = vpop.permute.xlu0 %1388 }
 0x3ea   : > { %v1422_v22 = vpop.permute.xlu1 %1421 }
 0x3eb   : > { %v1417_v23 = vpop.permute.xlu0 %1416 }
 0x3ee   : > { %v1432_v29 = vpop.permute.xlu1 %1431 }
 0x3ef   : > { %v1427_v33 = vpop.permute.xlu0 %1426 }
 0x4b3   : > { %v2593_v2 = vpop.f32.mrb[8].mxu0 }
 0x4b4   : > { %v1397_v3 = vadd.f32 %v2593_v2, %v1384_v0  ;;  %v1348_v32 = vpop.f32.mrb[9].mxu0 }
 0x4b5   : > { %v1396_v4 = vadd.f32 %v1379_v1, %v1348_v32 }
 0x4b6   : > { %v1401_v6 = vmax.f32 %v1397_v3, 0.0 }
 0x4b7   : > { %v1400_v7 = vmax.f32 %v1396_v4, 0.0  ;;  %v2596_v9 = vpop.f32.mrb[10].mxu0 }
 0x4b8   : > { %v1399_v11 = vadd.f32 %v2596_v9, %v1394_v37  ;;  %v1358_v12 = vpop.f32.mrb[11].mxu0 }
 0x4b9   : > { %v2746_v13 = vpack.c.bf16 %v1401_v6, %v1400_v7  ;;  %v1398_v14 = vadd.f32 %v1389_v10, %v1358_v12 }
 0x4ba   : > { %v1403_v15 = vmax.f32 %v1399_v11, 0.0 }
 0x4bb   : > { %v1402_v16 = vmax.f32 %v1398_v14, 0.0  ;;  %2747 = vmatprep.subr.bf16.mxu1 %v2746_v13 }
 0x4bc   : > { %2749 = vmatpush3.bf16.msra.mxu1 %v2746_v13 }
 0x4bd   : > { %v2750_v17 = vpack.c.bf16 %v1403_v15, %v1402_v16 }
 0x4bf   : > { %2751 = vmatprep.subr.bf16.mxu1 %v2750_v17 }
 0x4c0   : > { %2753 = vmatpush3.bf16.msra.mxu1 %v2750_v17 }
 0x4c3   : > { %2606 = vmatmul.mubr.msk.f32.vlgmr.msra.gmra.mrb[4].mxu1 %vm497_vm2, %v2310_v19 }
 0x4c4   : > { %2608 = vmatprep.mubr.msk.f32.mxu1 %vm497_vm2, %v2311_v20 }
 0x4c7   : > { %2609 = vmatmul.mubr.msk.f32.gmra.mrb[6].mxu1 %vm497_vm2, %v2312_v21 }
 0x4c8   : > { %2619 = vmatprep.mubr.msk.f32.mxu1 %vm497_vm2, %v2325_v40 }
 0x596   : > { %v2607_v24 = vpop.f32.mrb[4].mxu1 }
 0x597   : > { %v1518_v25 = vadd.f32 %v2607_v24, %v1422_v22  ;;  %v1512_v26 = vpop.f32.mrb[5].mxu1 }
 0x598   : > { %v1513_v27 = vadd.f32 %v1512_v26, %v1417_v23  ;;  %v2322_v26 = vld [vmem:[%s3615_s3 + $0xc8] sm:$0xff] }
 0x599   : > { %v1532_v28 = vadd.f32 %v1518_v25, %v3302_v34 }
 0x59a   : > { %v1531_v30 = vadd.f32 %v1513_v27, %v3306_v5  ;;  %v2610_v31 = vpop.f32.mrb[6].mxu1  ;;  %v2323_v27 = vld [vmem:[%s3615_s3 + $0xd0] sm:$0xff] }
 0x59b   : > { %1536 = vst.msk [vmem:[#allocation2 + $0x20] sm:$0xff] %vm465_vm1, %v1532_v28  ;;  %v1528_v35 = vadd.f32 %v2610_v31, %v1432_v29  ;;  %v1522_v36 = vpop.f32.mrb[7].mxu1  ;;  %v2324_v29 = vld [vmem:[%s3615_s3 + $0xd8] sm:$0xff]  ;;  %v2338_v31 = vld [vmem:[%s3615_s3 + $0x108] sm:$0xff] }
 0x59c   : > { %1535 = vst.msk [vmem:[#allocation2 + $0x8] sm:$0xff] %vm465_vm1, %v1531_v30  ;;  %v1523_v38 = vadd.f32 %v1522_v36, %v1427_v33  ;;  %v2337_v30 = vld [vmem:[%s3615_s3 + $0x100] sm:$0xff]  ;;  %v2339_v33 = vld [vmem:[%s3615_s3 + $0x110] sm:$0xff] }
 0x59d   : > { %v1534_v41 = vadd.f32 %v1528_v35, %v3312_v39  ;;  %v2340_v35 = vld [vmem:[%s3615_s3 + $0x118] sm:$0xff]  ;;  %v2349_v36 = vld [vmem:[%s3617_s5 + $0x40] sm:$0xff] }
 0x59e   : > { %v1533_v34 = vadd.f32 %v1523_v38, %v3316_v8  ;;  %2661 = vmatprep.mubr.msk.f32.mxu0 %vm497_vm2, %v2349_v36 }
 0x59f   : > { %1538 = vst.msk [vmem:[#allocation2 + $0x50] sm:$0xff] %vm465_vm1, %v1534_v41 }
 0x5a0   : > { %1537 = vst.msk [vmem:[#allocation2 + $0x38] sm:$0xff] %vm465_vm1, %v1533_v34 }
 0x5a2   : > { %v3426_v5 = vld [vmem:[#allocation2 + $0x20] sm:$0xff] }
 0x5a3   : > { %v2930_v42 = vpack.i.bf16 %v3426_v5, %v3025_v18  ;;  %v3430_v43 = vld [vmem:[#allocation2 + $0x8] sm:$0xff] }
 0x5a4   : > { %v2935_v44 = vpack.i.bf16 %v3430_v43, %v3025_v18  ;;  %v2754_v39 = vpack.c.bf16 %v3426_v5, %v3430_v43  ;;  %v2950_v51 = vpack.i.bf16 %v3426_v5, %v3430_v43 }
 0x5a5   : > { %2931 = vrot.lane.b32.xlu1 %v2930_v42, %s3030_s24 }
 0x5a6   : > { %2936 = vrot.lane.b32.xlu0 %v2935_v44, %s3030_s24  ;;  %2755 = vmatprep.subr.bf16.mxu1 %v2754_v39  ;;  %v3436_v8 = vld [vmem:[#allocation2 + $0x50] sm:$0xff] }
 0x5a7   : > { %2757 = vmatpush3.bf16.msra.mxu1 %v2754_v39  ;;  %v2945_v45 = vpack.i.bf16 %v3436_v8, %v3025_v18  ;;  %v3440_v46 = vld [vmem:[#allocation2 + $0x38] sm:$0xff] }
 0x5a8   : > { %v2940_v47 = vpack.i.bf16 %v3440_v46, %v3025_v18  ;;  %v2758_v48 = vpack.c.bf16 %v3436_v8, %v3440_v46  ;;  %v2955_v49 = vpack.i.bf16 %v3436_v8, %v3440_v46  ;;  %v2327_v18 = vld [vmem:[%s3615_s3 + $0xf0] sm:$0xff] }
 0x5a9   : > { %2946 = vrot.lane.b32.xlu1 %v2945_v45, %s3030_s24 }
 0x5aa   : > { %2941 = vrot.lane.b32.xlu0 %v2940_v47, %s3030_s24  ;;  %2759 = vmatprep.subr.bf16.mxu1 %v2758_v48  ;;  %s2368_s24 = sshll.u32 %s3106_s13, 8  ;;  %s3571_s13 = scalar_lea.sflag [#allocation4], %s323_s17 }
 0x5ab   : > { %2761 = vmatpush3.bf16.msra.mxu1 %v2758_v48  ;;  %s3567_s27 = scalar_lea.hbm %s3621_s9, %s2368_s24 }
 0x5ad   : > { %2956 = vrot.lane.b32.xlu1 %v2955_v49, %s3031_s29 }
 0x5ae   : > { %2951 = vrot.lane.b32.xlu0 %v2950_v51, %s3031_s29  ;;  %2620 = vmatmul.mubr.msk.f32.vlgmr.msra.gmra.mrb[8].mxu1 %vm497_vm2, %v2326_v50  ;;  %s3032_s29 = smov [#allocation3]  }
 0x5af   : > { %2622 = vmatprep.mubr.msk.f32.mxu1 %vm497_vm2, %v2327_v18  ;;  %s2964_s14 = sshll.u32 %s3032_s29, 4  ;;  %s2965_s14 = int_to_ptr.vmem [resolvable:$false] %s2964_s14 }
 0x5b0   : > { %s2966_s16 = scalar_lea.vmem %s2965_s14, 512  ;;  %p2967_p0 = scmp.lt.s32.totalorder %s3562_s23, %s2965_s14 }
 0x5b1   : > { %1914 = vperm.xlu1 %2869, %v2346_v52   ;;  %p2968_p1 = scmp.lt.s32.totalorder %s2966_s16, %s2960_s28 }
 0x5b2   : > { %1909 = vperm.xlu0 %2868, %v2345_v53   ;;  %2623 = vmatmul.mubr.msk.f32.gmra.mrb[10].mxu1 %vm497_vm2, %v2328_v54 }
 0x5b3   : > { %2633 = vmatprep.mubr.msk.f32.mxu1 %vm497_vm2, %v2321_v55  ;;  %p2969_p2 = por %p2968_p1, %p2967_p0 }
 0x5b5   : > { %1924 = vperm.xlu1 %2869, %v2348_v56   ;;  %v2350_v56 = vld [vmem:[%s3617_s5 + $0x48] sm:$0xff]  ;;  %p2970_p3 = pnand %p2969_p2, %p2963_p13 }
 0x5b6   : > { %1919 = vperm.xlu0 %2868, %v2347_v57   ;;  %v2351_v57 = vld [vmem:[%s3617_s5 + $0x50] sm:$0xff] }
 0x5b9   : > { %1952 = vperm.xlu1 %2869, %v2354_v58   ;;  %v2352_v58 = vld [vmem:[%s3617_s5 + $0x58] sm:$0xff] }
 0x5ba   : > { %1947 = vperm.xlu0 %2868, %v2353_v59   ;;  %v2070_v59 = vld [vmem:[%s3619_s7] sm:$0xff] }
 0x5bd   : > { %1962 = vperm.xlu1 %2869, %v2356_v60  }
 0x5be   : > { %1957 = vperm.xlu0 %2868, %v2355_v61  }
 0x5c1   : > { %2085 = vperm.xlu1 %2869, %v2077_v62  }
 0x5c2   : > { %2080 = vperm.xlu0 %2868, %v2076_v63  }
 0x617   : > { %v2932_v0 = vpop.permute.xlu1 %2931 }
 0x618   : > { %v2934_v1 = vunpack.i.h.bf16 %v2932_v0  ;;  %v2933_v2 = vunpack.i.l.bf16 %v2932_v0  ;;  %v2937_v3 = vpop.permute.xlu0 %2936 }
 0x619   : > { %v2939_v32 = vunpack.i.h.bf16 %v2937_v3  ;;  %v2938_v4 = vunpack.i.l.bf16 %v2937_v3 }
 0x61a   : > { %v1680_v6 = vsel %vm1678_vm5, %v2933_v2, %v2934_v1 }
 0x61b   : > { %v2947_v37 = vpop.permute.xlu1 %2946  ;;  %v1679_v7 = vsel %vm1678_vm5, %v2938_v4, %v2939_v32 }
 0x61c   : > { %v2949_v9 = vunpack.i.h.bf16 %v2947_v37  ;;  %v2948_v10 = vunpack.i.l.bf16 %v2947_v37  ;;  %v2942_v11 = vpop.permute.xlu0 %2941  ;;  %v2762_v12 = vpack.c.bf16 %v1680_v6, %v1679_v7 }
 0x61d   : > { %v2944_v13 = vunpack.i.h.bf16 %v2942_v11  ;;  %v2943_v14 = vunpack.i.l.bf16 %v2942_v11 }
 0x61e   : > { %2763 = vmatprep.subr.bf16.mxu1 %v2762_v12  ;;  %v1682_v15 = vsel %vm1678_vm5, %v2948_v10, %v2949_v9 }
 0x61f   : > { %v2957_v16 = vpop.permute.xlu1 %2956  ;;  %2765 = vmatpush3.bf16.msra.mxu1 %v2762_v12  ;;  %v1681_v17 = vsel %vm1678_vm5, %v2943_v14, %v2944_v13 }
 0x620   : > { %v2952_v19 = vpop.permute.xlu0 %2951  ;;  %v2766_v20 = vpack.c.bf16 %v1682_v15, %v1681_v17  ;;  %v2959_v23 = vunpack.i.h.bf16 %v2957_v16  ;;  %v2958_v24 = vunpack.i.l.bf16 %v2957_v16 }
 0x621   : > { %v2954_v21 = vunpack.i.h.bf16 %v2952_v19  ;;  %v2953_v22 = vunpack.i.l.bf16 %v2952_v19 }
 0x622   : > { %2767 = vmatprep.subr.bf16.mxu1 %v2766_v20  ;;  %v2774_v28 = vpack.c.bf16 %v2959_v23, %v2958_v24 }
 0x623   : > { %v2770_v25 = vpack.c.bf16 %v2954_v21, %v2953_v22  ;;  %2769 = vmatpush3.bf16.msra.mxu1 %v2766_v20 }
 0x625   : > { %2771 = vmatprep.subr.bf16.mxu1 %v2770_v25 }
 0x626   : > { %2634 = vmatmul.mubr.msk.f32.vlgmr.msra.gmra.mrb[8].mxu1 %vm497_vm2, %v2322_v26 }
 0x627   : > { %2773 = vmatpush3.bf16.msra.mxu1 %v2770_v25  ;;  %2636 = vmatprep.mubr.msk.f32.mxu1 %vm497_vm2, %v2323_v27 }
 0x628   : > { %2775 = vmatprep.subr.bf16.mxu1 %v2774_v28 }
 0x62a   : > { %2637 = vmatmul.mubr.msk.f32.gmra.mrb[10].mxu1 %vm497_vm2, %v2324_v29 }
 0x62b   : > { %2777 = vmatpush3.bf16.msra.mxu1 %v2774_v28  ;;  %2647 = vmatprep.mubr.msk.f32.mxu1 %vm497_vm2, %v2337_v30 }
 0x62e   : > { %2648 = vmatmul.mubr.msk.f32.vlgmr.msra.gmra.mrb[8].mxu1 %vm497_vm2, %v2338_v31 }
 0x62f   : > { %2650 = vmatprep.mubr.msk.f32.mxu1 %vm497_vm2, %v2339_v33 }
 0x630   : > { %v1915_v38 = vpop.permute.xlu1 %1914 }
 0x631   : > { %v1910_v40 = vpop.permute.xlu0 %1909 }
 0x632   : > { %2651 = vmatmul.mubr.msk.f32.gmra.mrb[10].mxu1 %vm497_vm2, %v2340_v35 }
 0x634   : > { %v1925_v45 = vpop.permute.xlu1 %1924 }
 0x635   : > { %v1920_v49 = vpop.permute.xlu0 %1919 }
 0x638   : > { %v1953_v60 = vpop.permute.xlu1 %1952 }
 0x639   : > { %v1948_v61 = vpop.permute.xlu0 %1947 }
 0x63c   : > { %v1963_v3 = vpop.permute.xlu1 %1962 }
 0x63d   : > { %v1958_v6 = vpop.permute.xlu0 %1957 }
 0x641   : > { %v2081_v17 = vpop.permute.xlu0 %2080 }
 0x701   : > { %v2649_v41 = vpop.f32.mrb[8].mxu1 }
 0x702   : > { %v1928_v34 = vadd.f32 %v2649_v41, %v1915_v38  ;;  %v1879_v42 = vpop.f32.mrb[9].mxu1 }
 0x703   : > { %v1927_v44 = vadd.f32 %v1910_v40, %v1879_v42 }
 0x704   : > { %v1932_v39 = vmax.f32 %v1928_v34, 0.0 }
 0x705   : > { %v1931_v47 = vmax.f32 %v1927_v44, 0.0  ;;  %v2652_v48 = vpop.f32.mrb[10].mxu1 }
 0x706   : > { %v1930_v50 = vadd.f32 %v2652_v48, %v1925_v45  ;;  %v1889_v51 = vpop.f32.mrb[11].mxu1 }
 0x707   : > { %v2778_v18 = vpack.c.bf16 %v1932_v39, %v1931_v47  ;;  %v1929_v52 = vadd.f32 %v1920_v49, %v1889_v51 }
 0x708   : > { %v1934_v53 = vmax.f32 %v1930_v50, 0.0 }
 0x709   : > { %v1933_v54 = vmax.f32 %v1929_v52, 0.0  ;;  %2779 = vmatprep.subr.bf16.mxu0 %v2778_v18 }
 0x70a   : > { %2781 = vmatpush3.bf16.msra.mxu0 %v2778_v18 }
 0x70b   : > { %v2782_v55 = vpack.c.bf16 %v1934_v53, %v1933_v54 }
 0x70d   : > { %2783 = vmatprep.subr.bf16.mxu0 %v2782_v55 }
 0x70e   : > { %2785 = vmatpush3.bf16.msra.mxu0 %v2782_v55 }
 0x711   : > { %2662 = vmatmul.mubr.msk.f32.vlgmr.msra.gmra.mrb[12].mxu0 %vm497_vm2, %v2350_v56 }
 0x712   : > { %2664 = vmatprep.mubr.msk.f32.mxu0 %vm497_vm2, %v2351_v57 }
 0x715   : > { %2665 = vmatmul.mubr.msk.f32.gmra.mrb[14].mxu0 %vm497_vm2, %v2352_v58 }
 0x716   : > { %2675 = vmatprep.mubr.msk.f32.mxu0 %vm497_vm2, %v2070_v59 }
 0x7e4   : > { %v2663_v62 = vpop.f32.mrb[12].mxu0 }
 0x7e5   : > { %v2049_v63 = vadd.f32 %v2663_v62, %v1953_v60  ;;  %v2043_v0 = vpop.f32.mrb[13].mxu0 }
 0x7e6   : > { %v2044_v1 = vadd.f32 %v2043_v0, %v1948_v61 }
 0x7e7   : > { %v2063_v2 = vadd.f32 %v2049_v63, %v3426_v5 }
 0x7e8   : > { %v2062_v32 = vadd.f32 %v2044_v1, %v3430_v43  ;;  %v2666_v4 = vpop.f32.mrb[14].mxu0 }
 0x7e9   : > { %2067 = vst.msk [vmem:[#allocation2 + $0x20] sm:$0xff] %vm465_vm1, %v2063_v2  ;;  %v2059_v37 = vadd.f32 %v2666_v4, %v1963_v3  ;;  %v2053_v7 = vpop.f32.mrb[15].mxu0 }
 0x7ea   : > { %2066 = vst.msk [vmem:[#allocation2 + $0x8] sm:$0xff] %vm465_vm1, %v2062_v32  ;;  %v2054_v9 = vadd.f32 %v2053_v7, %v1958_v6 }
 0x7eb   : > { %v2065_v10 = vadd.f32 %v2059_v37, %v3436_v8  ;;  %v2071_v8 = vld [vmem:[%s3619_s7 + $0x8] sm:$0xff] }
 0x7ec   : > { %v2064_v11 = vadd.f32 %v2054_v9, %v3440_v46  ;;  %v2086_v46 = vpop.permute.xlu1 %2085 }
 0x7ed   : > { %2069 = vst.msk [vmem:[#allocation2 + $0x50] sm:$0xff] %vm465_vm1, %v2065_v10 }
 0x7ee   : > { %2068 = vst.msk [vmem:[#allocation2 + $0x38] sm:$0xff] %vm465_vm1, %v2064_v11 }
 0x7f0   : > { %v2073_v5 = vld [vmem:[#allocation2 + $0x20] sm:$0xff] }
 0x7f1   : > { %v2072_v43 = vld [vmem:[#allocation2 + $0x8] sm:$0xff] }
 0x7f2   : > { %v2786_v12 = vpack.c.bf16 %v2073_v5, %v2072_v43 }
 0x7f4   : > { %2787 = vmatprep.subr.bf16.mxu0 %v2786_v12  ;;  %v2075_v13 = vld [vmem:[#allocation2 + $0x50] sm:$0xff] }
 0x7f5   : > { %2789 = vmatpush3.bf16.msra.mxu0 %v2786_v12  ;;  %v2074_v14 = vld [vmem:[#allocation2 + $0x38] sm:$0xff] }
 0x7f6   : > { %v2790_v15 = vpack.c.bf16 %v2075_v13, %v2074_v14 }
 0x7f8   : > { %2791 = vmatprep.subr.bf16.mxu0 %v2790_v15 }
 0x7f9   : > { %2793 = vmatpush3.bf16.msra.mxu0 %v2790_v15 }
 0x7fc   : > { %2676 = vmatmul.mubr.msk.f32.vlgmr.msra.gmra.mrb[16].mxu0 %vm497_vm2, %v2071_v8 }
 0x8cf   : > { %v2677_v16 = vpop.f32.mrb[16].mxu0 }
 0x8d0   : > { %v2166_v19 = vadd.f32 %v2677_v16, %v2086_v46  ;;  %v2160_v20 = vpop.f32.mrb[17].mxu0 }
 0x8d1   : > { %v2161_v21 = vadd.f32 %v2160_v20, %v2081_v17 }
 0x8d2   : > { %2170 = vst.msk [vmem:[%s325_s22 + $0x8] sm:$0xff] %vm465_vm1, %v2166_v19 }
 0x8d3   : > { %2169 = vst.msk [vmem:[%s325_s22] sm:$0xff] %vm465_vm1, %v2161_v21 }
 0x8d4   : > { %2973 = shalt.err (!%p2970_p3)
}
 0x8d5   : > { %s2974_s17 = scalar_lea.hbm %s3567_s27, 256  ;;  %s2978_s24 = scalar_lea.hbm %s3621_s9, 512 }
 0x8d6   : > { %p2975_p4 = scmp.ne.s32.totalorder %s3567_s27, %s2974_s17  ;;  %p2979_p9 = scmp.lt.u32.totalorder %s3567_s27, %s3621_s9 }
 0x8d7   : > { %p2980_p10 = scmp.lt.u32.totalorder %s2978_s24, %s2974_s17  ;;  %p2982_p12 = scmp.lt.u32.totalorder %s2974_s17, %s3567_s27 }
 0x8d8   : > { %p2976_p7 = pnand %p2975_p4, %p3123_p5 }
 0x8d9   : > { %p2981_p11 = por %p2980_p10, %p2979_p9 }
 0x8da   : > { %p2977_p8 = pneg %p2976_p7 }
 0x8db   : > { %p2983_p13 = por %p2982_p12, %p2981_p11 }
 0x8dd   : > { %p2984_p0 = pnand %p2983_p13, %p2977_p8 }
 0x8df   : > { %2987 = shalt.err (!%p2984_p0)
}
 0x8e0   : > { %s3033_s28 = smov 128   ;;  %s3034_s29 = smov 8  }
 0x8e1   : > { %2819 = dma.vmem_to_hbm [thread:$0]  (%p3123_p5), %s3562_s23, 256, %s3567_s27, %s3571_s13, %s3033_s28, %s3033_s28, %s3034_s29  }
 0x8e2 PF: > { %p2825_p1 = scmp.ge.s32.totalorder %s3022_s12, 2  ;;  %s2200_s14 = sand.u32 1, %s3010_s30  }
 0x8e3   : > { %s2201_s16 = scalar_lea.sflag [#allocation4], %s2200_s14 }
 0x8e4   : > { %p2822_p2 = pnand %p2825_p1, %p3127_p6 }
 0x8e6   : > { %3005 = dma.done.wait (!%p2822_p2), %s2201_s16, 256  }
 0x8e7   : > { %3007 = vsyncadd (!%p2822_p2), %s2201_s16, 4294967040  ;;  %p19_p3 = scmp.ge.s32.totalorder %s3110_s15, 4   ;;  %s3624_s30 = smov %s3014_s10 }
 0x8e8   : > { %s3625_s10 = smov %s3018_s11  ;;  %s3626_s11 = smov %s3121_s18 }
 0x8e9   : > { %s3627_s12 = smov %s3110_s15  ;;  %21 = sbr.rel (!%p19_p3) target bundleno = 3 (0x3), region = 105 }
 0x8f0   :  { %2206 = vsyncpa [#allocation4], 1 }
 0x8f1   :  { %2208 = vsyncpa [#allocation4 + $0x1], 1 }

</bundles_post_ra>
